<compile_context>
chip_gen: v7x
topology: tpu7x:2x2x1
jax: 0.10.0
libtpu: 0.0.40
codegen_flags: <defaults>
</compile_context>

<pallas_src>
import functools

import jax
import jax.numpy as jnp
from jax import lax
from jax.experimental import pallas as pl
from jax.experimental.pallas import tpu as pltpu


def _round_up(x, m):
    return (x + m - 1) // m * m


def _gru_kernel(x_ref, wih_ref, whh_ref, bih_ref, bhn_ref, o_ref,
                h_scr, gx_scr, *, T, unroll):
    """One grid step = one chunk of Tc timesteps.

    x_ref   : (Tc*Bp, F)     time-major chunk, rows = Tc blocks of Bp
    wih_ref : (F, 3*Hp)      fused input->hidden weights, gates [r | z | n]
    whh_ref : (Hp, 3*Hp)     fused hidden->hidden weights, gates [r | z | n]
    bih_ref : (1, 3*Hp)      input bias with b_hr/b_hz folded in (n keeps b_in)
    bhn_ref : (1, Hp)        hidden bias of the n gate (multiplied by r)
    o_ref   : (Bp, Hp)       final hidden state h_T (written on last chunk)
    h_scr   : (Bp, Hp)       persistent hidden-state carry across chunks
    gx_scr  : (Tc*Bp, 3*Hp)  input projections for this chunk
    """
    c = pl.program_id(0)
    n_rows, _ = x_ref.shape
    Bp, Hp = h_scr.shape
    Tc = n_rows // Bp

    @pl.when(c == 0)
    def _():
        h_scr[...] = jnp.zeros_like(h_scr)

    # ---- Phase 1 (non-recurrent): one MXU matmul for the whole chunk.
    #      Operands may be bf16; accumulate + bias in f32. ----
    gx_scr[...] = jnp.dot(x_ref[...], wih_ref[...],
                          preferred_element_type=jnp.float32) + bih_ref[...]

    # ---- Phase 2: serial recurrence over the chunk; h lives in vregs. ----
    whh = whh_ref[...]
    bhn = jnp.broadcast_to(bhn_ref[...], (Bp, Hp))  # hoisted out of the loop
    base = c * Tc

    def step(t, h):
        off = pl.multiple_of(t * Bp, 8)
        gx_t = gx_scr[pl.ds(off, Bp), :]                              # (Bp, 3Hp)
        gh = jnp.dot(h, whh, preferred_element_type=jnp.float32)      # (Bp, 3Hp)
        # Fused r/z sigmoid over the contiguous [0:2Hp] lane slab.
        rz = jax.nn.sigmoid(gx_t[:, :2 * Hp] + gh[:, :2 * Hp])
        r = rz[:, :Hp]
        z = rz[:, Hp:]
        n = jnp.tanh(gx_t[:, 2 * Hp:] + r * (gh[:, 2 * Hp:] + bhn))
        h_new = n + z * (h - n)                                       # (1-z)*n + z*h
        if T % Tc != 0:  # static check: mask padded timesteps of the last chunk
            h_new = jnp.where(base + t < T, h_new, h)
        return h_new

    h = lax.fori_loop(0, Tc, step, h_scr[...], unroll=unroll)
    h_scr[...] = h

    @pl.when(c == pl.num_programs(0) - 1)
    def _():
        o_ref[...] = h


def gru_last_hidden(x, w_ih, w_hh, b_ih, b_hh, *, chunk_t=16, phase1_bf16=True):
    """Equivalent of `_, hn = torch.nn.GRU(batch_first=True)(x); return hn[-1]`.

    x    : (B, T, F) batch_first input
    w_ih : (3H, F)   torch weight_ih_l0   (gate order r, z, n)
    w_hh : (3H, H)   torch weight_hh_l0
    b_ih : (3H,)     torch bias_ih_l0
    b_hh : (3H,)     torch bias_hh_l0
    returns (B, H) float32
    """
    B, T, F = x.shape
    H = w_hh.shape[1]
    f32 = jnp.float32

    Bp = _round_up(B, 8)        # sublane multiple
    Hp = _round_up(H, 128)      # lane multiple -> gate slabs are lane-dense
    Tc = min(chunk_t, T)        # timesteps per grid step
    nchunks = pl.cdiv(T, Tc)
    Tpad = nchunks * Tc

    dot_dtype = jnp.bfloat16 if phase1_bf16 else f32

    # --- Repack weights: per-gate zero-pad H, fuse gates along lanes ---------
    wih_g = w_ih.astype(f32).reshape(3, H, F)                       # (gate, out, in)
    whh_g = w_hh.astype(f32).reshape(3, H, H)
    wih_p = jnp.zeros((3, Hp, F), f32).at[:, :H, :].set(wih_g)      # F kept natural
    whh_p = jnp.zeros((3, Hp, Hp), f32).at[:, :H, :H].set(whh_g)
    wih_f = jnp.transpose(wih_p, (2, 0, 1)).reshape(F, 3 * Hp).astype(dot_dtype)
    whh_f = jnp.transpose(whh_p, (2, 0, 1)).reshape(Hp, 3 * Hp)     # stays f32

    # --- Biases: fold b_hr, b_hz into the input-side bias (exact);
    #     b_hn must stay separate (it is multiplied by r). --------------------
    bih3 = b_ih.astype(f32).reshape(3, H)
    bhh3 = b_hh.astype(f32).reshape(3, H)
    bih_fold = jnp.stack([bih3[0] + bhh3[0], bih3[1] + bhh3[1], bih3[2]])   # (3,H)
    bih_f = jnp.zeros((3, Hp), f32).at[:, :H].set(bih_fold).reshape(1, 3 * Hp)
    bhn_f = jnp.zeros((1, Hp), f32).at[0, :H].set(bhh3[2])

    # --- Time-major, batch-padded input; F left at its natural width. -------
    x_tm = jnp.transpose(x.astype(f32), (1, 0, 2))                  # (T, B, F)
    x_pad = jnp.zeros((Tpad, Bp, F), f32).at[:T, :B, :].set(x_tm)
    x2d = x_pad.reshape(Tpad * Bp, F).astype(dot_dtype)

    kernel = functools.partial(_gru_kernel, T=T, unroll=min(Tc, 8))

    out_p = pl.pallas_call(
        kernel,
        out_shape=jax.ShapeDtypeStruct((Bp, Hp), f32),
        grid=(nchunks,),
        in_specs=[
            pl.BlockSpec((Tc * Bp, F), lambda t: (t, 0)),       # streamed x chunk
            pl.BlockSpec((F, 3 * Hp), lambda t: (0, 0)),        # resident weights
            pl.BlockSpec((Hp, 3 * Hp), lambda t: (0, 0)),
            pl.BlockSpec((1, 3 * Hp), lambda t: (0, 0)),
            pl.BlockSpec((1, Hp), lambda t: (0, 0)),
        ],
        out_specs=pl.BlockSpec((Bp, Hp), lambda t: (0, 0)),
        scratch_shapes=[
            pltpu.VMEM((Bp, Hp), f32),              # persistent h carry
            pltpu.VMEM((Tc * Bp, 3 * Hp), f32),     # per-chunk input projections
        ],
        compiler_params=pltpu.CompilerParams(
            dimension_semantics=("arbitrary",),     # serial recurrence over chunks
            vmem_limit_bytes=48 * 1024 * 1024,      # explicit budget (v7x-safe)
        ),
    )(x2d, wih_f, whh_f, bih_f, bhn_f)

    return out_p[:B, :H]


def gru_last_hidden_ref(x, w_ih, w_hh, b_ih, b_hh):
    """Pure-JAX reference (same math as torch.nn.GRU)."""
    w_ir, w_iz, w_in = jnp.split(w_ih, 3, axis=0)
    w_hr, w_hz, w_hn = jnp.split(w_hh, 3, axis=0)
    b_ir, b_iz, b_in = jnp.split(b_ih, 3)
    b_hr, b_hz, b_hn = jnp.split(b_hh, 3)

    def step(h, x_t):
        r = jax.nn.sigmoid(x_t @ w_ir.T + b_ir + h @ w_hr.T + b_hr)
        z = jax.nn.sigmoid(x_t @ w_iz.T + b_iz + h @ w_hz.T + b_hz)
        n = jnp.tanh(x_t @ w_in.T + b_in + r * (h @ w_hn.T + b_hn))
        return n + z * (h - n), None

    h0 = jnp.zeros((x.shape[0], w_hh.shape[1]), jnp.float32)
    hT, _ = lax.scan(step, h0, jnp.transpose(x, (1, 0, 2)))
    return hT


if __name__ == "__main__":
    # Small shapes consistent with the module: GRUNet(n_features=4, hidden_dim=32)
    B, T, F, H = 2, 8, 4, 32

    key = jax.random.PRNGKey(0)
    k_x, k_wih, k_whh, k_bih, k_bhh = jax.random.split(key, 5)

    # Deterministic init matching torch's U(-1/sqrt(H), 1/sqrt(H)) scheme.
    bound = 1.0 / jnp.sqrt(jnp.float32(H))
    w_ih = jax.random.uniform(k_wih, (3 * H, F), jnp.float32, -bound, bound)
    w_hh = jax.random.uniform(k_whh, (3 * H, H), jnp.float32, -bound, bound)
    b_ih = jax.random.uniform(k_bih, (3 * H,), jnp.float32, -bound, bound)
    b_hh = jax.random.uniform(k_bhh, (3 * H,), jnp.float32, -bound, bound)

    x = jax.random.normal(k_x, (B, T, F), jnp.float32)

    ref = jax.block_until_ready(gru_last_hidden_ref(x, w_ih, w_hh, b_ih, b_hh))

    # 1) Exact-parity check (f32 phase-1), single chunk.
    out_f32 = jax.block_until_ready(
        gru_last_hidden(x, w_ih, w_hh, b_ih, b_hh, phase1_bf16=False))
    assert out_f32.shape == (B, H)
    assert jnp.allclose(out_f32, ref, atol=1e-5, rtol=1e-5), "f32 mismatch vs reference"

    # 2) Exact-parity check with a non-dividing chunk size (exercises the
    #    multi-chunk grid, the persistent h carry and the padded-step mask).
    out_chunked = jax.block_until_ready(
        gru_last_hidden(x, w_ih, w_hh, b_ih, b_hh, chunk_t=3, phase1_bf16=False))
    assert jnp.allclose(out_chunked, ref, atol=1e-5, rtol=1e-5), "chunked mismatch"

    # 3) Fast path: bf16 operands for the phase-1 matmul (gate math stays f32).
    out_bf16 = jax.block_until_ready(
        gru_last_hidden(x, w_ih, w_hh, b_ih, b_hh, phase1_bf16=True))
    assert jnp.allclose(out_bf16, ref, atol=2e-2, rtol=2e-2), "bf16 mismatch"

    print("KERNEL_OK")
</pallas_src>

<mosaic_0001>
module attributes {stable_mosaic.version = 11 : i64} {
  func.func @_gru_kernel(%arg0: i32, %arg1: memref<64x4xf32, #tpu.memory_space<vmem>>, %arg2: memref<4x384xf32, #tpu.memory_space<vmem>>, %arg3: memref<128x384xf32, #tpu.memory_space<vmem>>, %arg4: memref<1x384xf32, #tpu.memory_space<vmem>>, %arg5: memref<1x128xf32, #tpu.memory_space<vmem>>, %arg6: memref<8x128xf32, #tpu.memory_space<vmem>>, %arg7: memref<8x128xf32, #tpu.memory_space<vmem>>, %arg8: memref<64x384xf32, #tpu.memory_space<vmem>>) attributes {dimension_semantics = [#tpu.dimension_semantics<arbitrary>], iteration_bounds = array<i64: 1>, scalar_prefetch = 0 : i64, scratch_operands = 2 : i64, tpu.core_type = #tpu.core_type<tc>, window_params = [{transform_indices = @transform_0, window_bounds = array<i64: 64, 4>}, {pipeline_mode = #tpu.pipeline_mode<synchronous>, transform_indices = @transform_1, window_bounds = array<i64: 4, 384>}, {pipeline_mode = #tpu.pipeline_mode<synchronous>, transform_indices = @transform_2, window_bounds = array<i64: 128, 384>}, {pipeline_mode = #tpu.pipeline_mode<synchronous>, transform_indices = @transform_3, window_bounds = array<i64: 1, 384>}, {pipeline_mode = #tpu.pipeline_mode<synchronous>, transform_indices = @transform_4, window_bounds = array<i64: 1, 128>}, {pipeline_mode = #tpu.pipeline_mode<synchronous>, transform_indices = @transform_5, window_bounds = array<i64: 8, 128>}]} {
    %c0_i32 = arith.constant 0 : i32
    %0 = arith.cmpi eq, %arg0, %c0_i32 : i32
    %1 = arith.extui %0 : i1 to i32
    %c0_i32_0 = arith.constant 0 : i32
    %2 = arith.cmpi ne, %1, %c0_i32_0 : i32
    scf.if %2 {
      %cst_51 = arith.constant 0.000000e+00 : f32
      %211 = vector.broadcast %cst_51 : f32 to vector<8x128xf32>
      %c0_52 = arith.constant 0 : index
      %c0_53 = arith.constant 0 : index
      %212 = vector.load %arg7[%c0_52, %c0_53] : memref<8x128xf32, #tpu.memory_space<vmem>>, vector<8x128xf32>
      tpu.vector_store %arg7[%c0_52, %c0_53], %211 {strides = array<i32>} : memref<8x128xf32, #tpu.memory_space<vmem>>, vector<8x128xf32>,
    } else {
    }
    %c0 = arith.constant 0 : index
    %c0_1 = arith.constant 0 : index
    %3 = vector.load %arg1[%c0, %c0_1] : memref<64x4xf32, #tpu.memory_space<vmem>>, vector<64x4xf32>
    %c0_2 = arith.constant 0 : index
    %c0_3 = arith.constant 0 : index
    %4 = vector.load %arg2[%c0_2, %c0_3] : memref<4x384xf32, #tpu.memory_space<vmem>>, vector<4x384xf32>
    %cst = arith.constant dense<0.000000e+00> : vector<64x384xf32>
    %5 = tpu.matmul %3, %4, %cst {dimension_numbers = #tpu.dot_dimension_numbers<[1], [0], [0], [1], [0, 0, 1, 1], [], []>} : vector<64x4xf32>, vector<4x384xf32>, vector<64x384xf32> -> vector<64x384xf32>
    %c0_4 = arith.constant 0 : index
    %c0_5 = arith.constant 0 : index
    %6 = vector.load %arg4[%c0_4, %c0_5] : memref<1x384xf32, #tpu.memory_space<vmem>>, vector<1x384xf32>
    %7 = vector.broadcast %6 : vector<1x384xf32> to vector<64x384xf32>
    %8 = arith.addf %5, %7 : vector<64x384xf32>
    %c0_6 = arith.constant 0 : index
    %c0_7 = arith.constant 0 : index
    %9 = vector.load %arg8[%c0_6, %c0_7] : memref<64x384xf32, #tpu.memory_space<vmem>>, vector<64x384xf32>
    tpu.vector_store %arg8[%c0_6, %c0_7], %8 {strides = array<i32>} : memref<64x384xf32, #tpu.memory_space<vmem>>, vector<64x384xf32>,
    %c0_8 = arith.constant 0 : index
    %c0_9 = arith.constant 0 : index
    %10 = vector.load %arg3[%c0_8, %c0_9] : memref<128x384xf32, #tpu.memory_space<vmem>>, vector<128x384xf32>
    %c0_10 = arith.constant 0 : index
    %c0_11 = arith.constant 0 : index
    %11 = vector.load %arg5[%c0_10, %c0_11] : memref<1x128xf32, #tpu.memory_space<vmem>>, vector<1x128xf32>
    %12 = vector.shape_cast %11 : vector<1x128xf32> to vector<1x128xf32>
    %13 = vector.broadcast %12 : vector<1x128xf32> to vector<8x128xf32>
    %c0_12 = arith.constant 0 : index
    %c0_13 = arith.constant 0 : index
    %14 = vector.load %arg7[%c0_12, %c0_13] : memref<8x128xf32, #tpu.memory_space<vmem>>, vector<8x128xf32>
    %c0_i32_14 = arith.constant 0 : i32
    %c8_i32 = arith.constant 8 : i32
    %15 = arith.muli %c0_i32_14, %c8_i32 : i32
    %16 = tpu.assume_multiple %15, 8 : i32
    %17 = arith.index_cast %16 : i32 to index
    %c0_15 = arith.constant 0 : index
    %18 = vector.load %arg8[%17, %c0_15] : memref<64x384xf32, #tpu.memory_space<vmem>>, vector<8x384xf32>
    %cst_16 = arith.constant dense<0.000000e+00> : vector<8x384xf32>
    %19 = tpu.matmul %14, %10, %cst_16 {dimension_numbers = #tpu.dot_dimension_numbers<[1], [0], [0], [1], [0, 0, 1, 1], [], []>} : vector<8x128xf32>, vector<128x384xf32>, vector<8x384xf32> -> vector<8x384xf32>
    %20 = vector.extract_strided_slice %18 {offsets = [0, 0], sizes = [8, 256], strides = [1, 1]} : vector<8x384xf32> to vector<8x256xf32>
    %21 = vector.extract_strided_slice %19 {offsets = [0, 0], sizes = [8, 256], strides = [1, 1]} : vector<8x384xf32> to vector<8x256xf32>
    %22 = arith.addf %20, %21 : vector<8x256xf32>
    %23 = arith.negf %22 : vector<8x256xf32>
    %24 = math.exp %23 : vector<8x256xf32>
    %cst_17 = arith.constant 1.000000e+00 : f32
    %25 = vector.broadcast %cst_17 : f32 to vector<8x256xf32>
    %26 = arith.addf %25, %24 : vector<8x256xf32>
    %27 = arith.divf %25, %26 : vector<8x256xf32>
    %28 = vector.extract_strided_slice %27 {offsets = [0, 0], sizes = [8, 128], strides = [1, 1]} : vector<8x256xf32> to vector<8x128xf32>
    %29 = vector.extract_strided_slice %27 {offsets = [0, 128], sizes = [8, 128], strides = [1, 1]} : vector<8x256xf32> to vector<8x128xf32>
    %30 = vector.extract_strided_slice %18 {offsets = [0, 256], sizes = [8, 128], strides = [1, 1]} : vector<8x384xf32> to vector<8x128xf32>
    %31 = vector.extract_strided_slice %19 {offsets = [0, 256], sizes = [8, 128], strides = [1, 1]} : vector<8x384xf32> to vector<8x128xf32>
    %32 = arith.addf %31, %13 : vector<8x128xf32>
    %33 = arith.mulf %28, %32 : vector<8x128xf32>
    %34 = arith.addf %30, %33 : vector<8x128xf32>
    %35 = math.tanh %34 : vector<8x128xf32>
    %36 = arith.subf %14, %35 : vector<8x128xf32>
    %37 = arith.mulf %29, %36 : vector<8x128xf32>
    %38 = arith.addf %35, %37 : vector<8x128xf32>
    %c1_i32 = arith.constant 1 : i32
    %c8_i32_18 = arith.constant 8 : i32
    %39 = arith.muli %c1_i32, %c8_i32_18 : i32
    %40 = tpu.assume_multiple %39, 8 : i32
    %41 = arith.index_cast %40 : i32 to index
    %c0_19 = arith.constant 0 : index
    %42 = vector.load %arg8[%41, %c0_19] : memref<64x384xf32, #tpu.memory_space<vmem>>, vector<8x384xf32>
    %cst_20 = arith.constant dense<0.000000e+00> : vector<8x384xf32>
    %43 = tpu.matmul %38, %10, %cst_20 {dimension_numbers = #tpu.dot_dimension_numbers<[1], [0], [0], [1], [0, 0, 1, 1], [], []>} : vector<8x128xf32>, vector<128x384xf32>, vector<8x384xf32> -> vector<8x384xf32>
    %44 = vector.extract_strided_slice %42 {offsets = [0, 0], sizes = [8, 256], strides = [1, 1]} : vector<8x384xf32> to vector<8x256xf32>
    %45 = vector.extract_strided_slice %43 {offsets = [0, 0], sizes = [8, 256], strides = [1, 1]} : vector<8x384xf32> to vector<8x256xf32>
    %46 = arith.addf %44, %45 : vector<8x256xf32>
    %47 = arith.negf %46 : vector<8x256xf32>
    %48 = math.exp %47 : vector<8x256xf32>
    %cst_21 = arith.constant 1.000000e+00 : f32
    %49 = vector.broadcast %cst_21 : f32 to vector<8x256xf32>
    %50 = arith.addf %49, %48 : vector<8x256xf32>
    %51 = arith.divf %49, %50 : vector<8x256xf32>
    %52 = vector.extract_strided_slice %51 {offsets = [0, 0], sizes = [8, 128], strides = [1, 1]} : vector<8x256xf32> to vector<8x128xf32>
    %53 = vector.extract_strided_slice %51 {offsets = [0, 128], sizes = [8, 128], strides = [1, 1]} : vector<8x256xf32> to vector<8x128xf32>
    %54 = vector.extract_strided_slice %42 {offsets = [0, 256], sizes = [8, 128], strides = [1, 1]} : vector<8x384xf32> to vector<8x128xf32>
    %55 = vector.extract_strided_slice %43 {offsets = [0, 256], sizes = [8, 128], strides = [1, 1]} : vector<8x384xf32> to vector<8x128xf32>
    %56 = arith.addf %55, %13 : vector<8x128xf32>
    %57 = arith.mulf %52, %56 : vector<8x128xf32>
    %58 = arith.addf %54, %57 : vector<8x128xf32>
    %59 = math.tanh %58 : vector<8x128xf32>
    %60 = arith.subf %38, %59 : vector<8x128xf32>
    %61 = arith.mulf %53, %60 : vector<8x128xf32>
    %62 = arith.addf %59, %61 : vector<8x128xf32>
    %c2_i32 = arith.constant 2 : i32
    %c8_i32_22 = arith.constant 8 : i32
    %63 = arith.muli %c2_i32, %c8_i32_22 : i32
    %64 = tpu.assume_multiple %63, 8 : i32
    %65 = arith.index_cast %64 : i32 to index
    %c0_23 = arith.constant 0 : index
    %66 = vector.load %arg8[%65, %c0_23] : memref<64x384xf32, #tpu.memory_space<vmem>>, vector<8x384xf32>
    %cst_24 = arith.constant dense<0.000000e+00> : vector<8x384xf32>
    %67 = tpu.matmul %62, %10, %cst_24 {dimension_numbers = #tpu.dot_dimension_numbers<[1], [0], [0], [1], [0, 0, 1, 1], [], []>} : vector<8x128xf32>, vector<128x384xf32>, vector<8x384xf32> -> vector<8x384xf32>
    %68 = vector.extract_strided_slice %66 {offsets = [0, 0], sizes = [8, 256], strides = [1, 1]} : vector<8x384xf32> to vector<8x256xf32>
    %69 = vector.extract_strided_slice %67 {offsets = [0, 0], sizes = [8, 256], strides = [1, 1]} : vector<8x384xf32> to vector<8x256xf32>
    %70 = arith.addf %68, %69 : vector<8x256xf32>
    %71 = arith.negf %70 : vector<8x256xf32>
    %72 = math.exp %71 : vector<8x256xf32>
    %cst_25 = arith.constant 1.000000e+00 : f32
    %73 = vector.broadcast %cst_25 : f32 to vector<8x256xf32>
    %74 = arith.addf %73, %72 : vector<8x256xf32>
    %75 = arith.divf %73, %74 : vector<8x256xf32>
    %76 = vector.extract_strided_slice %75 {offsets = [0, 0], sizes = [8, 128], strides = [1, 1]} : vector<8x256xf32> to vector<8x128xf32>
    %77 = vector.extract_strided_slice %75 {offsets = [0, 128], sizes = [8, 128], strides = [1, 1]} : vector<8x256xf32> to vector<8x128xf32>
    %78 = vector.extract_strided_slice %66 {offsets = [0, 256], sizes = [8, 128], strides = [1, 1]} : vector<8x384xf32> to vector<8x128xf32>
    %79 = vector.extract_strided_slice %67 {offsets = [0, 256], sizes = [8, 128], strides = [1, 1]} : vector<8x384xf32> to vector<8x128xf32>
    %80 = arith.addf %79, %13 : vector<8x128xf32>
    %81 = arith.mulf %76, %80 : vector<8x128xf32>
    %82 = arith.addf %78, %81 : vector<8x128xf32>
    %83 = math.tanh %82 : vector<8x128xf32>
    %84 = arith.subf %62, %83 : vector<8x128xf32>
    %85 = arith.mulf %77, %84 : vector<8x128xf32>
    %86 = arith.addf %83, %85 : vector<8x128xf32>
    %c3_i32 = arith.constant 3 : i32
    %c8_i32_26 = arith.constant 8 : i32
    %87 = arith.muli %c3_i32, %c8_i32_26 : i32
    %88 = tpu.assume_multiple %87, 8 : i32
    %89 = arith.index_cast %88 : i32 to index
    %c0_27 = arith.constant 0 : index
    %90 = vector.load %arg8[%89, %c0_27] : memref<64x384xf32, #tpu.memory_space<vmem>>, vector<8x384xf32>
    %cst_28 = arith.constant dense<0.000000e+00> : vector<8x384xf32>
    %91 = tpu.matmul %86, %10, %cst_28 {dimension_numbers = #tpu.dot_dimension_numbers<[1], [0], [0], [1], [0, 0, 1, 1], [], []>} : vector<8x128xf32>, vector<128x384xf32>, vector<8x384xf32> -> vector<8x384xf32>
    %92 = vector.extract_strided_slice %90 {offsets = [0, 0], sizes = [8, 256], strides = [1, 1]} : vector<8x384xf32> to vector<8x256xf32>
    %93 = vector.extract_strided_slice %91 {offsets = [0, 0], sizes = [8, 256], strides = [1, 1]} : vector<8x384xf32> to vector<8x256xf32>
    %94 = arith.addf %92, %93 : vector<8x256xf32>
    %95 = arith.negf %94 : vector<8x256xf32>
    %96 = math.exp %95 : vector<8x256xf32>
    %cst_29 = arith.constant 1.000000e+00 : f32
    %97 = vector.broadcast %cst_29 : f32 to vector<8x256xf32>
    %98 = arith.addf %97, %96 : vector<8x256xf32>
    %99 = arith.divf %97, %98 : vector<8x256xf32>
    %100 = vector.extract_strided_slice %99 {offsets = [0, 0], sizes = [8, 128], strides = [1, 1]} : vector<8x256xf32> to vector<8x128xf32>
    %101 = vector.extract_strided_slice %99 {offsets = [0, 128], sizes = [8, 128], strides = [1, 1]} : vector<8x256xf32> to vector<8x128xf32>
    %102 = vector.extract_strided_slice %90 {offsets = [0, 256], sizes = [8, 128], strides = [1, 1]} : vector<8x384xf32> to vector<8x128xf32>
    %103 = vector.extract_strided_slice %91 {offsets = [0, 256], sizes = [8, 128], strides = [1, 1]} : vector<8x384xf32> to vector<8x128xf32>
    %104 = arith.addf %103, %13 : vector<8x128xf32>
    %105 = arith.mulf %100, %104 : vector<8x128xf32>
    %106 = arith.addf %102, %105 : vector<8x128xf32>
    %107 = math.tanh %106 : vector<8x128xf32>
    %108 = arith.subf %86, %107 : vector<8x128xf32>
    %109 = arith.mulf %101, %108 : vector<8x128xf32>
    %110 = arith.addf %107, %109 : vector<8x128xf32>
    %c4_i32 = arith.constant 4 : i32
    %c8_i32_30 = arith.constant 8 : i32
    %111 = arith.muli %c4_i32, %c8_i32_30 : i32
    %112 = tpu.assume_multiple %111, 8 : i32
    %113 = arith.index_cast %112 : i32 to index
    %c0_31 = arith.constant 0 : index
    %114 = vector.load %arg8[%113, %c0_31] : memref<64x384xf32, #tpu.memory_space<vmem>>, vector<8x384xf32>
    %cst_32 = arith.constant dense<0.000000e+00> : vector<8x384xf32>
    %115 = tpu.matmul %110, %10, %cst_32 {dimension_numbers = #tpu.dot_dimension_numbers<[1], [0], [0], [1], [0, 0, 1, 1], [], []>} : vector<8x128xf32>, vector<128x384xf32>, vector<8x384xf32> -> vector<8x384xf32>
    %116 = vector.extract_strided_slice %114 {offsets = [0, 0], sizes = [8, 256], strides = [1, 1]} : vector<8x384xf32> to vector<8x256xf32>
    %117 = vector.extract_strided_slice %115 {offsets = [0, 0], sizes = [8, 256], strides = [1, 1]} : vector<8x384xf32> to vector<8x256xf32>
    %118 = arith.addf %116, %117 : vector<8x256xf32>
    %119 = arith.negf %118 : vector<8x256xf32>
    %120 = math.exp %119 : vector<8x256xf32>
    %cst_33 = arith.constant 1.000000e+00 : f32
    %121 = vector.broadcast %cst_33 : f32 to vector<8x256xf32>
    %122 = arith.addf %121, %120 : vector<8x256xf32>
    %123 = arith.divf %121, %122 : vector<8x256xf32>
    %124 = vector.extract_strided_slice %123 {offsets = [0, 0], sizes = [8, 128], strides = [1, 1]} : vector<8x256xf32> to vector<8x128xf32>
    %125 = vector.extract_strided_slice %123 {offsets = [0, 128], sizes = [8, 128], strides = [1, 1]} : vector<8x256xf32> to vector<8x128xf32>
    %126 = vector.extract_strided_slice %114 {offsets = [0, 256], sizes = [8, 128], strides = [1, 1]} : vector<8x384xf32> to vector<8x128xf32>
    %127 = vector.extract_strided_slice %115 {offsets = [0, 256], sizes = [8, 128], strides = [1, 1]} : vector<8x384xf32> to vector<8x128xf32>
    %128 = arith.addf %127, %13 : vector<8x128xf32>
    %129 = arith.mulf %124, %128 : vector<8x128xf32>
    %130 = arith.addf %126, %129 : vector<8x128xf32>
    %131 = math.tanh %130 : vector<8x128xf32>
    %132 = arith.subf %110, %131 : vector<8x128xf32>
    %133 = arith.mulf %125, %132 : vector<8x128xf32>
    %134 = arith.addf %131, %133 : vector<8x128xf32>
    %c5_i32 = arith.constant 5 : i32
    %c8_i32_34 = arith.constant 8 : i32
    %135 = arith.muli %c5_i32, %c8_i32_34 : i32
    %136 = tpu.assume_multiple %135, 8 : i32
    %137 = arith.index_cast %136 : i32 to index
    %c0_35 = arith.constant 0 : index
    %138 = vector.load %arg8[%137, %c0_35] : memref<64x384xf32, #tpu.memory_space<vmem>>, vector<8x384xf32>
    %cst_36 = arith.constant dense<0.000000e+00> : vector<8x384xf32>
    %139 = tpu.matmul %134, %10, %cst_36 {dimension_numbers = #tpu.dot_dimension_numbers<[1], [0], [0], [1], [0, 0, 1, 1], [], []>} : vector<8x128xf32>, vector<128x384xf32>, vector<8x384xf32> -> vector<8x384xf32>
    %140 = vector.extract_strided_slice %138 {offsets = [0, 0], sizes = [8, 256], strides = [1, 1]} : vector<8x384xf32> to vector<8x256xf32>
    %141 = vector.extract_strided_slice %139 {offsets = [0, 0], sizes = [8, 256], strides = [1, 1]} : vector<8x384xf32> to vector<8x256xf32>
    %142 = arith.addf %140, %141 : vector<8x256xf32>
    %143 = arith.negf %142 : vector<8x256xf32>
    %144 = math.exp %143 : vector<8x256xf32>
    %cst_37 = arith.constant 1.000000e+00 : f32
    %145 = vector.broadcast %cst_37 : f32 to vector<8x256xf32>
    %146 = arith.addf %145, %144 : vector<8x256xf32>
    %147 = arith.divf %145, %146 : vector<8x256xf32>
    %148 = vector.extract_strided_slice %147 {offsets = [0, 0], sizes = [8, 128], strides = [1, 1]} : vector<8x256xf32> to vector<8x128xf32>
    %149 = vector.extract_strided_slice %147 {offsets = [0, 128], sizes = [8, 128], strides = [1, 1]} : vector<8x256xf32> to vector<8x128xf32>
    %150 = vector.extract_strided_slice %138 {offsets = [0, 256], sizes = [8, 128], strides = [1, 1]} : vector<8x384xf32> to vector<8x128xf32>
    %151 = vector.extract_strided_slice %139 {offsets = [0, 256], sizes = [8, 128], strides = [1, 1]} : vector<8x384xf32> to vector<8x128xf32>
    %152 = arith.addf %151, %13 : vector<8x128xf32>
    %153 = arith.mulf %148, %152 : vector<8x128xf32>
    %154 = arith.addf %150, %153 : vector<8x128xf32>
    %155 = math.tanh %154 : vector<8x128xf32>
    %156 = arith.subf %134, %155 : vector<8x128xf32>
    %157 = arith.mulf %149, %156 : vector<8x128xf32>
    %158 = arith.addf %155, %157 : vector<8x128xf32>
    %c6_i32 = arith.constant 6 : i32
    %c8_i32_38 = arith.constant 8 : i32
    %159 = arith.muli %c6_i32, %c8_i32_38 : i32
    %160 = tpu.assume_multiple %159, 8 : i32
    %161 = arith.index_cast %160 : i32 to index
    %c0_39 = arith.constant 0 : index
    %162 = vector.load %arg8[%161, %c0_39] : memref<64x384xf32, #tpu.memory_space<vmem>>, vector<8x384xf32>
    %cst_40 = arith.constant dense<0.000000e+00> : vector<8x384xf32>
    %163 = tpu.matmul %158, %10, %cst_40 {dimension_numbers = #tpu.dot_dimension_numbers<[1], [0], [0], [1], [0, 0, 1, 1], [], []>} : vector<8x128xf32>, vector<128x384xf32>, vector<8x384xf32> -> vector<8x384xf32>
    %164 = vector.extract_strided_slice %162 {offsets = [0, 0], sizes = [8, 256], strides = [1, 1]} : vector<8x384xf32> to vector<8x256xf32>
    %165 = vector.extract_strided_slice %163 {offsets = [0, 0], sizes = [8, 256], strides = [1, 1]} : vector<8x384xf32> to vector<8x256xf32>
    %166 = arith.addf %164, %165 : vector<8x256xf32>
    %167 = arith.negf %166 : vector<8x256xf32>
    %168 = math.exp %167 : vector<8x256xf32>
    %cst_41 = arith.constant 1.000000e+00 : f32
    %169 = vector.broadcast %cst_41 : f32 to vector<8x256xf32>
    %170 = arith.addf %169, %168 : vector<8x256xf32>
    %171 = arith.divf %169, %170 : vector<8x256xf32>
    %172 = vector.extract_strided_slice %171 {offsets = [0, 0], sizes = [8, 128], strides = [1, 1]} : vector<8x256xf32> to vector<8x128xf32>
    %173 = vector.extract_strided_slice %171 {offsets = [0, 128], sizes = [8, 128], strides = [1, 1]} : vector<8x256xf32> to vector<8x128xf32>
    %174 = vector.extract_strided_slice %162 {offsets = [0, 256], sizes = [8, 128], strides = [1, 1]} : vector<8x384xf32> to vector<8x128xf32>
    %175 = vector.extract_strided_slice %163 {offsets = [0, 256], sizes = [8, 128], strides = [1, 1]} : vector<8x384xf32> to vector<8x128xf32>
    %176 = arith.addf %175, %13 : vector<8x128xf32>
    %177 = arith.mulf %172, %176 : vector<8x128xf32>
    %178 = arith.addf %174, %177 : vector<8x128xf32>
    %179 = math.tanh %178 : vector<8x128xf32>
    %180 = arith.subf %158, %179 : vector<8x128xf32>
    %181 = arith.mulf %173, %180 : vector<8x128xf32>
    %182 = arith.addf %179, %181 : vector<8x128xf32>
    %c7_i32 = arith.constant 7 : i32
    %c8_i32_42 = arith.constant 8 : i32
    %183 = arith.muli %c7_i32, %c8_i32_42 : i32
    %184 = tpu.assume_multiple %183, 8 : i32
    %185 = arith.index_cast %184 : i32 to index
    %c0_43 = arith.constant 0 : index
    %186 = vector.load %arg8[%185, %c0_43] : memref<64x384xf32, #tpu.memory_space<vmem>>, vector<8x384xf32>
    %cst_44 = arith.constant dense<0.000000e+00> : vector<8x384xf32>
    %187 = tpu.matmul %182, %10, %cst_44 {dimension_numbers = #tpu.dot_dimension_numbers<[1], [0], [0], [1], [0, 0, 1, 1], [], []>} : vector<8x128xf32>, vector<128x384xf32>, vector<8x384xf32> -> vector<8x384xf32>
    %188 = vector.extract_strided_slice %186 {offsets = [0, 0], sizes = [8, 256], strides = [1, 1]} : vector<8x384xf32> to vector<8x256xf32>
    %189 = vector.extract_strided_slice %187 {offsets = [0, 0], sizes = [8, 256], strides = [1, 1]} : vector<8x384xf32> to vector<8x256xf32>
    %190 = arith.addf %188, %189 : vector<8x256xf32>
    %191 = arith.negf %190 : vector<8x256xf32>
    %192 = math.exp %191 : vector<8x256xf32>
    %cst_45 = arith.constant 1.000000e+00 : f32
    %193 = vector.broadcast %cst_45 : f32 to vector<8x256xf32>
    %194 = arith.addf %193, %192 : vector<8x256xf32>
    %195 = arith.divf %193, %194 : vector<8x256xf32>
    %196 = vector.extract_strided_slice %195 {offsets = [0, 0], sizes = [8, 128], strides = [1, 1]} : vector<8x256xf32> to vector<8x128xf32>
    %197 = vector.extract_strided_slice %195 {offsets = [0, 128], sizes = [8, 128], strides = [1, 1]} : vector<8x256xf32> to vector<8x128xf32>
    %198 = vector.extract_strided_slice %186 {offsets = [0, 256], sizes = [8, 128], strides = [1, 1]} : vector<8x384xf32> to vector<8x128xf32>
    %199 = vector.extract_strided_slice %187 {offsets = [0, 256], sizes = [8, 128], strides = [1, 1]} : vector<8x384xf32> to vector<8x128xf32>
    %200 = arith.addf %199, %13 : vector<8x128xf32>
    %201 = arith.mulf %196, %200 : vector<8x128xf32>
    %202 = arith.addf %198, %201 : vector<8x128xf32>
    %203 = math.tanh %202 : vector<8x128xf32>
    %204 = arith.subf %182, %203 : vector<8x128xf32>
    %205 = arith.mulf %197, %204 : vector<8x128xf32>
    %206 = arith.addf %203, %205 : vector<8x128xf32>
    %c8_i32_46 = arith.constant 8 : i32
    %c0_47 = arith.constant 0 : index
    %c0_48 = arith.constant 0 : index
    %207 = vector.load %arg7[%c0_47, %c0_48] : memref<8x128xf32, #tpu.memory_space<vmem>>, vector<8x128xf32>
    tpu.vector_store %arg7[%c0_47, %c0_48], %206 {strides = array<i32>} : memref<8x128xf32, #tpu.memory_space<vmem>>, vector<8x128xf32>,
    %c0_i32_49 = arith.constant 0 : i32
    %208 = arith.cmpi eq, %arg0, %c0_i32_49 : i32
    %209 = arith.extui %208 : i1 to i32
    %c0_i32_50 = arith.constant 0 : i32
    %210 = arith.cmpi ne, %209, %c0_i32_50 : i32
    scf.if %210 {
      %c0_51 = arith.constant 0 : index
      %c0_52 = arith.constant 0 : index
      %211 = vector.load %arg6[%c0_51, %c0_52] : memref<8x128xf32, #tpu.memory_space<vmem>>, vector<8x128xf32>
      tpu.vector_store %arg6[%c0_51, %c0_52], %206 {strides = array<i32>} : memref<8x128xf32, #tpu.memory_space<vmem>>, vector<8x128xf32>,
    } else {
    }
    return
  }
  func.func @transform_0(%arg0: i32) -> (i32, i32) {
    %c0_i32 = arith.constant 0 : i32
    %c0_i32_0 = arith.constant 0 : i32
    return %arg0, %c0_i32 : i32, i32
  }
  func.func @transform_1(%arg0: i32) -> (i32, i32) {
    %c0_i32 = arith.constant 0 : i32
    %c0_i32_0 = arith.constant 0 : i32
    %c0_i32_1 = arith.constant 0 : i32
    return %c0_i32, %c0_i32_0 : i32, i32
  }
  func.func @transform_2(%arg0: i32) -> (i32, i32) {
    %c0_i32 = arith.constant 0 : i32
    %c0_i32_0 = arith.constant 0 : i32
    %c0_i32_1 = arith.constant 0 : i32
    return %c0_i32, %c0_i32_0 : i32, i32
  }
  func.func @transform_3(%arg0: i32) -> (i32, i32) {
    %c0_i32 = arith.constant 0 : i32
    %c0_i32_0 = arith.constant 0 : i32
    %c0_i32_1 = arith.constant 0 : i32
    return %c0_i32, %c0_i32_0 : i32, i32
  }
  func.func @transform_4(%arg0: i32) -> (i32, i32) {
    %c0_i32 = arith.constant 0 : i32
    %c0_i32_0 = arith.constant 0 : i32
    %c0_i32_1 = arith.constant 0 : i32
    return %c0_i32, %c0_i32_0 : i32, i32
  }
  func.func @transform_5(%arg0: i32) -> (i32, i32) {
    %c0_i32 = arith.constant 0 : i32
    %c0_i32_0 = arith.constant 0 : i32
    %c0_i32_1 = arith.constant 0 : i32
    return %c0_i32, %c0_i32_0 : i32, i32
  }
}

</mosaic_0001>

<bundles_post_ra>
// kernel: tpu_custom_call.1
= control target key start
LH: loop header
LB: loop body
LE: loop exit
PB: predicated region body
PF: predicated region fallthrough
CT: control target
= control target key end

     0   :  { %10 = vsyncpa [#allocation5], 0  ;;  %s3368_s0 = inlined_call_operand.vmem [shape: f32[64,4], index: 0, kind: input, shape index: {}]   ;;  %s3369_s1 = inlined_call_operand.vmem [shape: f32[4,384], index: 1, kind: input, shape index: {}]   ;;  %s3370_s2 = inlined_call_operand.hbm [shape: f32[128,384], index: 2, kind: input, shape index: {}]   ;;  %s3371_s3 = inlined_call_operand.vmem [shape: f32[1,384], index: 3, kind: input, shape index: {}]   ;;  %s3372_s4 = inlined_call_operand.vmem [shape: f32[1,128], index: 4, kind: input, shape index: {}]   ;;  %s3373_s5 = inlined_call_operand.hbm [shape: f32[8,128], index: 5, kind: output, shape index: {}]  }
   0x1   :  { %11 = vsyncpa [#allocation6], 0  ;;  %s2862_s18 = smov [#allocation4]   ;;  %s2814_s22 = scalar_lea.hbm %s3370_s2, 6144 }
   0x2   :  { %s21_s19 = sshll.u32 %s2862_s18, 4  ;;  %p2815_p0 = scmp.ne.s32.totalorder %s3370_s2, %s2814_s22  ;;  %s22_s19 = int_to_ptr.vmem [resolvable:$true] %s21_s19 }
   0x3   :  { %p2818_p1 = scmp.lt.u32.totalorder %s2814_s22, %s3370_s2 }
   0x5   :  { %p2820_p2 = pnand %p2818_p1, %p2815_p0 }
   0x7   :  { %2823 = shalt.err (!%p2820_p2)
}
   0x8   :  { %s2824_s27 = scalar_lea.vmem %s22_s19, 6144  ;;  %p2829_p4 = scmp.lt.s32.totalorder %s22_s19, %s22_s19 }
   0x9   :  { %p2825_p3 = scmp.ne.s32.totalorder %s22_s19, %s2824_s27  ;;  %p2830_p5 = scmp.lt.s32.totalorder %s2824_s27, %s2824_s27 }
   0xb   :  { %p2831_p6 = por %p2830_p5, %p2829_p4 }
   0xd   :  { %p2832_p7 = pnand %p2831_p6, %p2825_p3 }
   0xf   :  { %2835 = shalt.err (!%p2832_p7)
}
  0x10   :  { %s2863_s28 = smov 384   ;;  %s2864_s29 = smov 24  }
  0x11   :  { %27 = dma.hbm_to_vmem [thread:$0]  %s3370_s2, 6144, %s22_s19, [#allocation5], %s2863_s28, %s2863_s28, %s2864_s29  }
  0x12   :  { %2858 = dma.done.wait [#allocation5], 6144  }
  0x13   :  { %2859 = vsyncadd [#allocation5], 4294961152  ;;  %v2865_v0 = vmov 0.0   ;;  %v48_v1 = vld [vmem:[%s3369_s1] sm:$0xff]  ;;  %vm95_vm0 = vcmask 1043456   ;;  %vm70_vm1 = vcmask 31744  }
  0x14   :  { %166 = vmatprep.mubr.f32.mxu0 %v2865_v0  ;;  %v40_v2 = vld [vmem:[%s3368_s0] sm:$0xff]  ;;  %v345_v3 = vld [vmem:[#allocation4 + $0x8] sm:$0xff]  ;;  %v69_v4 = vcombine.high %v48_v1, %v48_v1  ;;  %v347_v7 = vld [vmem:[#allocation4 + $0x18] sm:$0xff]  ;;  %v2866_v34 = vmov 0.0|0.0   ;;  %vm2867_vm2 = vmmov 0  }
  0x15   :  { %v348_v5 = vld [vmem:[#allocation4 + $0x20] sm:$0xff]  ;;  %1954 = vmatprep.mubr.msk.f32.mxu1 %vm70_vm1, %v40_v2  ;;  %v351_v10 = vld [vmem:[#allocation4 + $0x38] sm:$0xff]  ;;  %v354_v11 = vld [vmem:[#allocation4 + $0x50] sm:$0xff] }
  0x16   :  { %v344_v6 = vld [vmem:[#allocation4] sm:$0xff]  ;;  %v2919_v8 = vpack.c.bf16 %v348_v5, %v345_v3  ;;  %1771 = vmatprep.subr.msk.mxu0 %vm95_vm0, %v69_v4  ;;  %v2924_v12 = vpack.c.bf16 %v354_v11, %v351_v10  ;;  %v350_v13 = vld [vmem:[#allocation4 + $0x30] sm:$0xff]  ;;  %v353_v14 = vld [vmem:[#allocation4 + $0x48] sm:$0xff] }
  0x17   :  { %v2921_v9 = vpack.c.bf16 %v347_v7, %v344_v6  ;;  %1772 = vmatpush1.msk.msra.mxu0 %vm95_vm0, %v48_v1  ;;  %v357_v15 = vld [vmem:[#allocation4 + $0x68] sm:$0xff]  ;;  %v360_v16 = vld [vmem:[#allocation4 + $0x80] sm:$0xff]  ;;  %v2934_v18 = vpack.c.bf16 %v353_v14, %v350_v13  ;;  %v359_v21 = vld [vmem:[#allocation4 + $0x78] sm:$0xff] }
  0x18   :  { %1773 = vmatmul.mubr.msk.f32.vlgmr.msra.gmra.mrb[0].mxu0 %vm70_vm1, %v40_v2  ;;  %2247 = vmatprep.subr.bf16.mxu0 %v2919_v8  ;;  %v41_v17 = vld [vmem:[%s3368_s0 + $0x8] sm:$0xff]  ;;  %v2937_v19 = vpack.c.bf16 %v360_v16, %v357_v15  ;;  %v356_v20 = vld [vmem:[#allocation4 + $0x60] sm:$0xff]  ;;  %v363_v22 = vld [vmem:[#allocation4 + $0x98] sm:$0xff] }
  0x19   :  { %2249 = vmatpush1.bf16.msra.mxu0 %v2921_v9  ;;  %172 = vmatprep.mubr.f32.mxu0 %v2865_v0  ;;  %v366_v23 = vld [vmem:[#allocation4 + $0xb0] sm:$0xff]  ;;  %v2945_v25 = vpack.c.bf16 %v359_v21, %v356_v20  ;;  %v49_v26 = vld [vmem:[%s3369_s1 + $0x8] sm:$0xf]  ;;  %v372_v31 = vld [vmem:[#allocation4 + $0xe0] sm:$0xff] }
  0x1a   :  { %2251 = vmatprep.subr.bf16.mxu0 %v2924_v12  ;;  %v42_v24 = vld [vmem:[%s3368_s0 + $0x10] sm:$0xff]  ;;  %v2951_v27 = vpack.c.bf16 %v366_v23, %v363_v22  ;;  %v365_v29 = vld [vmem:[#allocation4 + $0xa8] sm:$0xff]  ;;  %1952 = vmatprep.subr.msk.mxu1 %vm95_vm0, %v49_v26  ;;  %v43_v36 = vld [vmem:[%s3368_s0 + $0x18] sm:$0xff] }
  0x1b   :  { %v362_v28 = vld [vmem:[#allocation4 + $0x90] sm:$0xff]  ;;  %v369_v30 = vld [vmem:[#allocation4 + $0xc8] sm:$0xff]  ;;  %1953 = vmatpush3.msk.msra.mxu1 %vm95_vm0, %v49_v26  ;;  %v352_v38 = vld [vmem:[#allocation4 + $0x40] sm:$0xff] }
  0x1c   :  { %1774 = vmatmul.mubr.msk.f32.gmra.mrb[2].mxu0 %vm70_vm1, %v41_v17  ;;  %v346_v32 = vld [vmem:[#allocation4 + $0x10] sm:$0xff]  ;;  %v349_v33 = vld [vmem:[#allocation4 + $0x28] sm:$0xff]  ;;  %2278 = vmatprep.subr.bf16.mxu1 %v2866_v34  ;;  %v2964_v37 = vpack.c.bf16 %v365_v29, %v362_v28  ;;  %v2967_v39 = vpack.c.bf16 %v372_v31, %v369_v30  ;;  %v368_v40 = vld [vmem:[#allocation4 + $0xc0] sm:$0xff]  ;;  %v52_v29 = vlaneseq }
  0x1d   :  { %2253 = vmatpush1.bf16.msra.mxu0 %v2934_v18  ;;  %178 = vmatprep.mubr.f32.mxu0 %v2865_v0  ;;  %v2957_v35 = vpack.c.bf16 %v349_v33, %v346_v32  ;;  %v371_v41 = vld [vmem:[#allocation4 + $0xd8] sm:$0xff]  ;;  %v378_v44 = vld [vmem:[#allocation4 + $0x110] sm:$0xff]  ;;  %v361_v47 = vld [vmem:[#allocation4 + $0x88] sm:$0xff] }
  0x1e   :  { %2255 = vmatprep.subr.bf16.mxu0 %v2937_v19  ;;  %1955 = vmatmul.mubr.msk.f32.vlgmr.msra.gmra.mrb[0].mxu1 %vm70_vm1, %v41_v17  ;;  %v355_v42 = vld [vmem:[#allocation4 + $0x58] sm:$0xff]  ;;  %v358_v46 = vld [vmem:[#allocation4 + $0x70] sm:$0xff]  ;;  %v44_v48 = vld [vmem:[%s3368_s0 + $0x20] sm:$0xff]  ;;  %v2981_v49 = vpack.c.bf16 %v371_v41, %v368_v40  ;;  %v53_v30 = vshrl.u32 %v52_v29, 7 }
  0x1f   :  { %v375_v43 = vld [vmem:[#allocation4 + $0xf8] sm:$0xff]  ;;  %2280 = vmatpush3.bf16.msra.mxu1 %v2957_v35  ;;  %v2971_v45 = vpack.c.bf16 %v355_v42, %v352_v38  ;;  %1957 = vmatprep.mubr.msk.f32.mxu1 %vm70_vm1, %v42_v24  ;;  %v374_v51 = vld [vmem:[#allocation4 + $0xf0] sm:$0xff]  ;;  %v377_v52 = vld [vmem:[#allocation4 + $0x108] sm:$0xff]  ;;  %v2988_v55 = vpack.c.bf16 %v361_v47, %v358_v46 }
  0x20   :  { %1775 = vmatmul.mubr.msk.f32.gmra.mrb[4].mxu0 %vm70_vm1, %v42_v24  ;;  %2281 = vmatprep.subr.bf16.mxu1 %v2866_v34  ;;  %v2984_v50 = vpack.c.bf16 %v378_v44, %v375_v43  ;;  %v381_v53 = vld [vmem:[#allocation4 + $0x128] sm:$0xff]  ;;  %v384_v54 = vld [vmem:[#allocation4 + $0x140] sm:$0xff]  ;;  %v367_v57 = vld [vmem:[#allocation4 + $0xb8] sm:$0xff]  ;;  %v2998_v59 = vpack.c.bf16 %v377_v52, %v374_v51  ;;  %v62_v31 = vsub.s32 2, %v53_v30 }
  0x21   :  { %2257 = vmatpush1.bf16.msra.mxu0 %v2945_v25  ;;  %184 = vmatprep.mubr.f32.mxu0 %v2865_v0  ;;  %v364_v56 = vld [vmem:[#allocation4 + $0xa0] sm:$0xff]  ;;  %v45_v58 = vld [vmem:[%s3368_s0 + $0x28] sm:$0xff]  ;;  %v46_v60 = vld [vmem:[%s3368_s0 + $0x30] sm:$0xff]  ;;  %v3004_v61 = vpack.c.bf16 %v384_v54, %v381_v53 }
  0x22   :  { %2259 = vmatprep.subr.bf16.mxu0 %v2951_v27  ;;  %1958 = vmatmul.mubr.msk.f32.gmra.mrb[2].mxu1 %vm70_vm1, %v43_v36  ;;  %v380_v62 = vld [vmem:[#allocation4 + $0x120] sm:$0xff]  ;;  %v383_v63 = vld [vmem:[#allocation4 + $0x138] sm:$0xff]  ;;  %v390_v2 = vld [vmem:[#allocation4 + $0x170] sm:$0xff]  ;;  %v3008_v3 = vpack.c.bf16 %v367_v57, %v364_v56  ;;  %v54_v57 = vsub.s32 0, %v53_v30 }
  0x23   :  { %2283 = vmatpush3.bf16.msra.mxu1 %v2971_v45  ;;  %1960 = vmatprep.mubr.msk.f32.mxu1 %vm70_vm1, %v44_v48  ;;  %v387_v1 = vld [vmem:[#allocation4 + $0x158] sm:$0xff]  ;;  %v370_v4 = vld [vmem:[#allocation4 + $0xd0] sm:$0xff]  ;;  %v373_v5 = vld [vmem:[#allocation4 + $0xe8] sm:$0xff]  ;;  %v3015_v6 = vpack.c.bf16 %v383_v63, %v380_v62  ;;  %v58_v63 = vsub.s32 1, %v53_v30 }
  0x24   :  { %1776 = vmatmul.mubr.msk.f32.gmra.mrb[6].mxu0 %vm70_vm1, %v43_v36  ;;  %2284 = vmatprep.subr.bf16.mxu1 %v2866_v34  ;;  %v47_v7 = vld [vmem:[%s3368_s0 + $0x38] sm:$0xff]  ;;  %v3021_v10 = vpack.c.bf16 %v390_v2, %v387_v1  ;;  %v386_v11 = vld [vmem:[#allocation4 + $0x150] sm:$0xff]  ;;  %v389_v13 = vld [vmem:[#allocation4 + $0x168] sm:$0xff]  ;;  %v3025_v14 = vpack.c.bf16 %v373_v5, %v370_v4 }
  0x25   :  { %2261 = vmatpush1.bf16.msra.mxu0 %v2964_v37  ;;  %190 = vmatprep.mubr.f32.mxu0 %v2865_v0  ;;  %v376_v15 = vld [vmem:[#allocation4 + $0x100] sm:$0xff]  ;;  %v379_v16 = vld [vmem:[#allocation4 + $0x118] sm:$0xff]  ;;  %v3033_v17 = vpack.c.bf16 %v389_v13, %v386_v11  ;;  %v382_v21 = vld [vmem:[#allocation4 + $0x130] sm:$0xff] }
  0x26   :  { %2263 = vmatprep.subr.bf16.mxu0 %v2967_v39  ;;  %1961 = vmatmul.mubr.msk.f32.gmra.mrb[4].mxu1 %vm70_vm1, %v45_v58  ;;  %v3037_v20 = vpack.c.bf16 %v379_v16, %v376_v15  ;;  %v385_v22 = vld [vmem:[#allocation4 + $0x148] sm:$0xff]  ;;  %v388_v24 = vld [vmem:[#allocation4 + $0x160] sm:$0xff]  ;;  %v391_v26 = vld [vmem:[#allocation4 + $0x178] sm:$0xff] }
  0x27   :  { %2286 = vmatpush3.bf16.msra.mxu1 %v2988_v55  ;;  %1963 = vmatprep.mubr.msk.f32.mxu1 %vm70_vm1, %v46_v60  ;;  %v3045_v23 = vpack.c.bf16 %v385_v22, %v382_v21  ;;  %v3053_v28 = vpack.c.bf16 %v391_v26, %v388_v24  ;;  %v50_v32 = vld [vmem:[%s3371_s3] sm:$0x7] }
  0x28   :  { %1777 = vmatmul.mubr.msk.f32.gmra.mrb[8].mxu0 %vm70_vm1, %v44_v48  ;;  %2287 = vmatprep.subr.bf16.mxu1 %v2866_v34  ;;  %v63_v33 = vrot.slane %v50_v32, %v62_v31  ;;  %v3111_v4 = vrot.slane %v50_v32, %v58_v63  ;;  %v3117_v21 = vld [vmem:[%s3372_s4] ss:$0 sm:$0xff]  ;;  %s2868_s4 = smov [#allocation7]  }
  0x29   :  { %2265 = vmatpush1.bf16.msra.mxu0 %v2981_v49  ;;  %196 = vmatprep.mubr.f32.mxu0 %v2865_v0  ;;  %s1755_s27 = sshll.u32 %s2868_s4, 4  ;;  %s1756_s27 = int_to_ptr.vmem [resolvable:$true] %s1755_s27 }
  0x2a   :  { %2267 = vmatprep.subr.bf16.mxu0 %v2984_v50  ;;  %1964 = vmatmul.mubr.msk.f32.gmra.mrb[6].mxu1 %vm70_vm1, %v47_v7  ;;  %s2836_s28 = scalar_lea.vmem %s1756_s27, 128  ;;  %p2841_p9 = scmp.lt.s32.totalorder %s1756_s27, %s1756_s27 }
  0x2b   :  { %2289 = vmatpush3.bf16.msra.mxu1 %v3008_v3  ;;  %1998 = vmatprep.mubr.msk.f32.mxu1 %vm2867_vm2, %v2865_v0  ;;  %p2837_p8 = scmp.ne.s32.totalorder %s1756_s27, %s2836_s28  ;;  %p2842_p10 = scmp.lt.s32.totalorder %s2836_s28, %s2836_s28 }
  0x2c   :  { %1778 = vmatmul.mubr.msk.f32.gmra.mrb[10].mxu0 %vm70_vm1, %v45_v58  ;;  %2290 = vmatprep.subr.bf16.mxu1 %v2866_v34  ;;  %v3108_v58 = vrot.slane %v50_v32, %v54_v57 }
  0x2d   :  { %2269 = vmatpush1.bf16.msra.mxu0 %v2998_v59  ;;  %202 = vmatprep.mubr.f32.mxu0 %v2865_v0  ;;  %p2843_p11 = por %p2842_p10, %p2841_p9 }
  0x2e   :  { %2271 = vmatprep.subr.bf16.mxu0 %v3004_v61 }
  0x2f   :  { %2292 = vmatpush3.bf16.msra.mxu1 %v3025_v14  ;;  %p2844_p12 = pnand %p2843_p11, %p2837_p8 }
  0x30   :  { %1779 = vmatmul.mubr.msk.f32.gmra.mrb[12].mxu0 %vm70_vm1, %v46_v60  ;;  %2293 = vmatprep.subr.bf16.mxu1 %v2866_v34 }
  0x31   :  { %2273 = vmatpush1.bf16.msra.mxu0 %v3015_v6  ;;  %208 = vmatprep.mubr.f32.mxu0 %v2865_v0 }
  0x32   :  { %2275 = vmatprep.subr.bf16.mxu0 %v3021_v10 }
  0x33   :  { %2295 = vmatpush3.bf16.msra.mxu1 %v3037_v20 }
  0x34   :  { %1780 = vmatmul.mubr.msk.f32.gmra.mrb[14].mxu0 %vm70_vm1, %v47_v7  ;;  %2296 = vmatprep.subr.bf16.mxu1 %v2866_v34 }
  0x35   :  { %2277 = vmatpush1.bf16.msra.mxu0 %v3033_v17  ;;  %470 = vmatprep.mubr.f32.mxu0 %v2865_v0 }
  0x36   :  { %2303 = vmatprep.subr.bf16.mxu0 %v2919_v8 }
  0x37   :  { %2298 = vmatpush3.bf16.msra.mxu1 %v3045_v23 }
  0x38   :  { %471 = vmatmul.mubr.f32.vlgmr.msra.gmra.mrb[0].mxu0 %v2865_v0  ;;  %2299 = vmatprep.subr.bf16.mxu1 %v2866_v34 }
  0x39   :  { %2305 = vmatpush1.bf16.msra.mxu0 %v2921_v9  ;;  %638 = vmatprep.mubr.f32.mxu0 %v2865_v0 }
  0x3a   :  { %2307 = vmatprep.subr.bf16.mxu0 %v2924_v12 }
  0x3b   :  { %2301 = vmatpush3.bf16.msra.mxu1 %v3053_v28 }
  0x3c   :  { %2334 = vmatprep.subr.bf16.mxu1 %v2866_v34 }
  0x3d   :  { %2309 = vmatpush1.bf16.msra.mxu0 %v2934_v18 }
  0x3e   :  { %2311 = vmatprep.subr.bf16.mxu0 %v2937_v19  ;;  %1999 = vmatmul.mubr.f32.vlgmr.msra.gmra.mrb[8].mxu1 %v2865_v0 }
  0x3f   :  { %2336 = vmatpush3.bf16.msra.mxu1 %v2957_v35  ;;  %2033 = vmatprep.mubr.msk.f32.mxu1 %vm2867_vm2, %v2865_v0 }
  0x40   :  { %2337 = vmatprep.subr.bf16.mxu1 %v2866_v34 }
  0x41   :  { %2313 = vmatpush1.bf16.msra.mxu0 %v2945_v25 }
  0x42   :  { %2315 = vmatprep.subr.bf16.mxu0 %v2951_v27 }
  0x43   :  { %2339 = vmatpush3.bf16.msra.mxu1 %v2971_v45 }
  0x44   :  { %2340 = vmatprep.subr.bf16.mxu1 %v2866_v34 }
  0x45   :  { %2317 = vmatpush1.bf16.msra.mxu0 %v2964_v37 }
  0x46   :  { %2319 = vmatprep.subr.bf16.mxu0 %v2967_v39 }
  0x47   :  { %2342 = vmatpush3.bf16.msra.mxu1 %v2988_v55 }
  0x48   :  { %2343 = vmatprep.subr.bf16.mxu1 %v2866_v34 }
  0x49   :  { %2321 = vmatpush1.bf16.msra.mxu0 %v2981_v49 }
  0x4a   :  { %2323 = vmatprep.subr.bf16.mxu0 %v2984_v50 }
  0x4b   :  { %2345 = vmatpush3.bf16.msra.mxu1 %v3008_v3 }
  0x4c   :  { %2346 = vmatprep.subr.bf16.mxu1 %v2866_v34 }
  0x4d   :  { %2325 = vmatpush1.bf16.msra.mxu0 %v2998_v59 }
  0x4e   :  { %2327 = vmatprep.subr.bf16.mxu0 %v3004_v61 }
  0x4f   :  { %2348 = vmatpush3.bf16.msra.mxu1 %v3025_v14 }
  0x50   :  { %2349 = vmatprep.subr.bf16.mxu1 %v2866_v34 }
  0x51   :  { %2329 = vmatpush1.bf16.msra.mxu0 %v3015_v6 }
  0x52   :  { %2331 = vmatprep.subr.bf16.mxu0 %v3021_v10 }
  0x53   :  { %2351 = vmatpush3.bf16.msra.mxu1 %v3037_v20 }
  0x54   :  { %2352 = vmatprep.subr.bf16.mxu1 %v2866_v34 }
  0x55   :  { %2333 = vmatpush1.bf16.msra.mxu0 %v3033_v17 }
  0x56   :  { %2359 = vmatprep.subr.bf16.mxu0 %v2919_v8 }
  0x57   :  { %2354 = vmatpush3.bf16.msra.mxu1 %v3045_v23 }
  0x58   :  { %2355 = vmatprep.subr.bf16.mxu1 %v2866_v34 }
  0x5b   :  { %2357 = vmatpush3.bf16.msra.mxu1 %v3053_v28 }
  0x5c   :  { %2390 = vmatprep.subr.bf16.mxu1 %v2866_v34 }
  0xf1   :  { %v1956_v36 = vpop.f32.mrb[0].mxu1 }
  0xf2   :  { %v3094_v38 = vadd.f32 %v1956_v36, %v63_v33  ;;  %v281_v40 = vpop.f32.mrb[1].mxu1 }
  0xf3   :  { %v282_v29 = vadd.f32 %v281_v40, %v63_v33 }
  0xf5   :  { %v1959_v41 = vpop.f32.mrb[2].mxu1 }
  0xf6   :  { %v3096_v42 = vadd.f32 %v1959_v41, %v63_v33  ;;  %v291_v43 = vpop.f32.mrb[3].mxu1 }
  0xf7   :  { %v3098_v44 = vadd.f32 %v291_v43, %v63_v33 }
  0xf9   :  { %v1962_v46 = vpop.f32.mrb[4].mxu1 }
  0xfa   :  { %v3100_v47 = vadd.f32 %v1962_v46, %v63_v33  ;;  %v301_v48 = vpop.f32.mrb[5].mxu1 }
  0xfb   :  { %v3102_v51 = vadd.f32 %v301_v48, %v63_v33 }
  0xfd   :  { %v1965_v52 = vpop.f32.mrb[6].mxu1 }
  0xfe   :  { %v3104_v53 = vadd.f32 %v1965_v52, %v63_v33  ;;  %v311_v54 = vpop.f32.mrb[7].mxu1 }
  0xff   :  { %v3106_v56 = vadd.f32 %v311_v54, %v63_v33 }
 0x10b   :  { %v472_v60 = vpop.f32.mrb[0].mxu0 }
 0x10c   :  { %v2694_v62 = vadd.f32 %v472_v60, %v3108_v58  ;;  %v474_v1 = vpop.f32.mrb[1].mxu0 }
 0x10d   :  { %v2695_v5 = vadd.f32 %v474_v1, %v3111_v4 }
 0x10e   :  { %v1791_v2 = vmul.f32 -1.442695, %v2694_v62 }
 0x10f   :  { %v1792_v13 = vmul.f32 -1.442695, %v2695_v5 }
 0x110   :  { %2734 = vpow2.f32 %v1791_v2 }
 0x111   :  { %v543_v7 = vpop.f32.mrb[8].mxu1  ;;  %2736 = vpow2.f32 %v1792_v13 }
 0x112   :  { %v2000_v11 = vpop.f32.mrb[9].mxu1  ;;  %v561_v22 = vadd.f32 %v3117_v21, %v543_v7 }
 0x11a   :  { %v2735_v15 = vpop.eup %2734 }
 0x11b   :  { %v555_v16 = vadd.f32 1.0, %v2735_v15  ;;  %v2737_v24 = vpop.eup %2736 }
 0x11c   :  { %v556_v31 = vadd.f32 1.0, %v2737_v24 }
 0x11d   :  { %2738 = vrcp.f32 %v555_v16 }
 0x127   :  { %v2739_v26 = vpop.eup %2738 }
 0x128   :  { %v562_v30 = vmul.f32 %v2739_v26, %v561_v22 }
 0x12a   :  { %v563_v32 = vadd.f32 %v562_v30, %v282_v29 }
 0x12c   :  { %2740 = vtanh.f32 %v563_v32 }
 0x12d   :  { %2742 = vrcp.f32 %v556_v31 }
 0x136   :  { %v2741_v36 = vpop.eup %2740 }
 0x137   :  { %v565_v41 = vsub.f32 0.0, %v2741_v36  ;;  %v2743_v43 = vpop.eup %2742 }
 0x139   :  { %v566_v46 = vmul.f32 %v2743_v43, %v565_v41 }
 0x13b   :  { %v567_v48 = vadd.f32 %v2741_v36, %v566_v46 }
 0x13d   :  { %639 = vmatmul.mubr.f32.vlgmr.msra.gmra.mrb[2].mxu0 %v567_v48  ;;  %2034 = vmatmul.mubr.f32.vlgmr.msra.gmra.mrb[10].mxu1 %v567_v48 }
 0x13e   :  { %2361 = vmatpush1.bf16.msra.mxu0 %v2921_v9  ;;  %2392 = vmatpush3.bf16.msra.mxu1 %v2957_v35 }
 0x13f   :  { %2363 = vmatprep.subr.bf16.mxu0 %v2924_v12  ;;  %2393 = vmatprep.subr.bf16.mxu1 %v2866_v34 }
 0x140   :  { %806 = vmatprep.mubr.f32.mxu0 %v2865_v0  ;;  %2068 = vmatprep.mubr.msk.f32.mxu1 %vm2867_vm2, %v2865_v0 }
 0x142   :  { %2365 = vmatpush1.bf16.msra.mxu0 %v2934_v18  ;;  %2395 = vmatpush3.bf16.msra.mxu1 %v2971_v45 }
 0x143   :  { %2367 = vmatprep.subr.bf16.mxu0 %v2937_v19  ;;  %2396 = vmatprep.subr.bf16.mxu1 %v2866_v34 }
 0x146   :  { %2369 = vmatpush1.bf16.msra.mxu0 %v2945_v25  ;;  %2398 = vmatpush3.bf16.msra.mxu1 %v2988_v55 }
 0x147   :  { %2371 = vmatprep.subr.bf16.mxu0 %v2951_v27  ;;  %2399 = vmatprep.subr.bf16.mxu1 %v2866_v34 }
 0x14a   :  { %2373 = vmatpush1.bf16.msra.mxu0 %v2964_v37  ;;  %2401 = vmatpush3.bf16.msra.mxu1 %v3008_v3 }
 0x14b   :  { %2375 = vmatprep.subr.bf16.mxu0 %v2967_v39  ;;  %2402 = vmatprep.subr.bf16.mxu1 %v2866_v34 }
 0x14e   :  { %2377 = vmatpush1.bf16.msra.mxu0 %v2981_v49  ;;  %2404 = vmatpush3.bf16.msra.mxu1 %v3025_v14 }
 0x14f   :  { %2379 = vmatprep.subr.bf16.mxu0 %v2984_v50  ;;  %2405 = vmatprep.subr.bf16.mxu1 %v2866_v34 }
 0x152   :  { %2381 = vmatpush1.bf16.msra.mxu0 %v2998_v59  ;;  %2407 = vmatpush3.bf16.msra.mxu1 %v3037_v20 }
 0x153   :  { %2383 = vmatprep.subr.bf16.mxu0 %v3004_v61  ;;  %2408 = vmatprep.subr.bf16.mxu1 %v2866_v34 }
 0x156   :  { %2385 = vmatpush1.bf16.msra.mxu0 %v3015_v6  ;;  %2410 = vmatpush3.bf16.msra.mxu1 %v3045_v23 }
 0x157   :  { %2387 = vmatprep.subr.bf16.mxu0 %v3021_v10  ;;  %2411 = vmatprep.subr.bf16.mxu1 %v2866_v34 }
 0x15a   :  { %2389 = vmatpush1.bf16.msra.mxu0 %v3033_v17  ;;  %2413 = vmatpush3.bf16.msra.mxu1 %v3053_v28 }
 0x15b   :  { %2415 = vmatprep.subr.bf16.mxu0 %v2919_v8  ;;  %2446 = vmatprep.subr.bf16.mxu1 %v2866_v34 }
 0x210   :  { %v640_v33 = vpop.f32.mrb[2].mxu0  ;;  %v711_v40 = vpop.f32.mrb[10].mxu1 }
 0x211   :  { %v2696_v52 = vadd.f32 %v640_v33, %v3108_v58  ;;  %v642_v54 = vpop.f32.mrb[3].mxu0  ;;  %v2035_v57 = vpop.f32.mrb[11].mxu1  ;;  %v729_v7 = vadd.f32 %v3117_v21, %v711_v40 }
 0x212   :  { %v2697_v62 = vadd.f32 %v642_v54, %v3111_v4 }
 0x213   :  { %v1793_v60 = vmul.f32 -1.442695, %v2696_v52 }
 0x214   :  { %v1794_v63 = vmul.f32 -1.442695, %v2697_v62 }
 0x215   :  { %2744 = vpow2.f32 %v1793_v60 }
 0x216   :  { %2746 = vpow2.f32 %v1794_v63 }
 0x21f   :  { %v2745_v1 = vpop.eup %2744 }
 0x220   :  { %v723_v2 = vadd.f32 1.0, %v2745_v1  ;;  %v2747_v5 = vpop.eup %2746 }
 0x221   :  { %v724_v16 = vadd.f32 1.0, %v2747_v5 }
 0x222   :  { %2748 = vrcp.f32 %v723_v2 }
 0x22c   :  { %v2749_v11 = vpop.eup %2748 }
 0x22d   :  { %v730_v13 = vmul.f32 %v2749_v11, %v729_v7 }
 0x22f   :  { %v731_v15 = vadd.f32 %v730_v13, %v3094_v38 }
 0x231   :  { %2750 = vtanh.f32 %v731_v15 }
 0x232   :  { %2752 = vrcp.f32 %v724_v16 }
 0x23b   :  { %v2751_v22 = vpop.eup %2750 }
 0x23c   :  { %v733_v24 = vsub.f32 %v567_v48, %v2751_v22  ;;  %v2753_v26 = vpop.eup %2752 }
 0x23e   :  { %v734_v29 = vmul.f32 %v2753_v26, %v733_v24 }
 0x240   :  { %v735_v30 = vadd.f32 %v2751_v22, %v734_v29 }
 0x242   :  { %807 = vmatmul.mubr.f32.vlgmr.msra.gmra.mrb[4].mxu0 %v735_v30  ;;  %2069 = vmatmul.mubr.f32.vlgmr.msra.gmra.mrb[12].mxu1 %v735_v30 }
 0x243   :  { %2417 = vmatpush1.bf16.msra.mxu0 %v2921_v9  ;;  %2448 = vmatpush3.bf16.msra.mxu1 %v2957_v35 }
 0x244   :  { %2419 = vmatprep.subr.bf16.mxu0 %v2924_v12  ;;  %2449 = vmatprep.subr.bf16.mxu1 %v2866_v34 }
 0x245   :  { %974 = vmatprep.mubr.f32.mxu0 %v2865_v0  ;;  %2103 = vmatprep.mubr.msk.f32.mxu1 %vm2867_vm2, %v2865_v0 }
 0x247   :  { %2421 = vmatpush1.bf16.msra.mxu0 %v2934_v18  ;;  %2451 = vmatpush3.bf16.msra.mxu1 %v2971_v45 }
 0x248   :  { %2423 = vmatprep.subr.bf16.mxu0 %v2937_v19  ;;  %2452 = vmatprep.subr.bf16.mxu1 %v2866_v34 }
 0x24b   :  { %2425 = vmatpush1.bf16.msra.mxu0 %v2945_v25  ;;  %2454 = vmatpush3.bf16.msra.mxu1 %v2988_v55 }
 0x24c   :  { %2427 = vmatprep.subr.bf16.mxu0 %v2951_v27  ;;  %2455 = vmatprep.subr.bf16.mxu1 %v2866_v34 }
 0x24f   :  { %2429 = vmatpush1.bf16.msra.mxu0 %v2964_v37  ;;  %2457 = vmatpush3.bf16.msra.mxu1 %v3008_v3 }
 0x250   :  { %2431 = vmatprep.subr.bf16.mxu0 %v2967_v39  ;;  %2458 = vmatprep.subr.bf16.mxu1 %v2866_v34 }
 0x253   :  { %2433 = vmatpush1.bf16.msra.mxu0 %v2981_v49  ;;  %2460 = vmatpush3.bf16.msra.mxu1 %v3025_v14 }
 0x254   :  { %2435 = vmatprep.subr.bf16.mxu0 %v2984_v50  ;;  %2461 = vmatprep.subr.bf16.mxu1 %v2866_v34 }
 0x257   :  { %2437 = vmatpush1.bf16.msra.mxu0 %v2998_v59  ;;  %2463 = vmatpush3.bf16.msra.mxu1 %v3037_v20 }
 0x258   :  { %2439 = vmatprep.subr.bf16.mxu0 %v3004_v61  ;;  %2464 = vmatprep.subr.bf16.mxu1 %v2866_v34 }
 0x25b   :  { %2441 = vmatpush1.bf16.msra.mxu0 %v3015_v6  ;;  %2466 = vmatpush3.bf16.msra.mxu1 %v3045_v23 }
 0x25c   :  { %2443 = vmatprep.subr.bf16.mxu0 %v3021_v10  ;;  %2467 = vmatprep.subr.bf16.mxu1 %v2866_v34 }
 0x25f   :  { %2445 = vmatpush1.bf16.msra.mxu0 %v3033_v17  ;;  %2469 = vmatpush3.bf16.msra.mxu1 %v3053_v28 }
 0x260   :  { %2471 = vmatprep.subr.bf16.mxu0 %v2919_v8  ;;  %2502 = vmatprep.subr.bf16.mxu1 %v2866_v34 }
 0x315   :  { %v808_v38 = vpop.f32.mrb[4].mxu0  ;;  %v879_v31 = vpop.f32.mrb[12].mxu1 }
 0x316   :  { %v2698_v32 = vadd.f32 %v808_v38, %v3108_v58  ;;  %v810_v36 = vpop.f32.mrb[5].mxu0  ;;  %v2070_v41 = vpop.f32.mrb[13].mxu1  ;;  %v897_v54 = vadd.f32 %v3117_v21, %v879_v31 }
 0x317   :  { %v2699_v46 = vadd.f32 %v810_v36, %v3111_v4 }
 0x318   :  { %v1795_v43 = vmul.f32 -1.442695, %v2698_v32 }
 0x319   :  { %v1796_v48 = vmul.f32 -1.442695, %v2699_v46 }
 0x31a   :  { %2754 = vpow2.f32 %v1795_v43 }
 0x31b   :  { %2756 = vpow2.f32 %v1796_v48 }
 0x324   :  { %v2755_v33 = vpop.eup %2754 }
 0x325   :  { %v891_v40 = vadd.f32 1.0, %v2755_v33  ;;  %v2757_v52 = vpop.eup %2756 }
 0x326   :  { %v892_v63 = vadd.f32 1.0, %v2757_v52 }
 0x327   :  { %2758 = vrcp.f32 %v891_v40 }
 0x331   :  { %v2759_v57 = vpop.eup %2758 }
 0x332   :  { %v898_v60 = vmul.f32 %v2759_v57, %v897_v54 }
 0x334   :  { %v899_v62 = vadd.f32 %v898_v60, %v3098_v44 }
 0x336   :  { %2760 = vtanh.f32 %v899_v62 }
 0x337   :  { %2762 = vrcp.f32 %v892_v63 }
 0x340   :  { %v2761_v1 = vpop.eup %2760 }
 0x341   :  { %v901_v2 = vsub.f32 %v735_v30, %v2761_v1  ;;  %v2763_v5 = vpop.eup %2762 }
 0x343   :  { %v902_v7 = vmul.f32 %v2763_v5, %v901_v2 }
 0x345   :  { %v903_v11 = vadd.f32 %v2761_v1, %v902_v7 }
 0x347   :  { %975 = vmatmul.mubr.f32.vlgmr.msra.gmra.mrb[6].mxu0 %v903_v11  ;;  %2104 = vmatmul.mubr.f32.vlgmr.msra.gmra.mrb[14].mxu1 %v903_v11 }
 0x348   :  { %2473 = vmatpush1.bf16.msra.mxu0 %v2921_v9  ;;  %2504 = vmatpush3.bf16.msra.mxu1 %v2957_v35 }
 0x349   :  { %2475 = vmatprep.subr.bf16.mxu0 %v2924_v12  ;;  %2505 = vmatprep.subr.bf16.mxu1 %v2866_v34 }
 0x34a   :  { %1142 = vmatprep.mubr.f32.mxu0 %v2865_v0  ;;  %2138 = vmatprep.mubr.msk.f32.mxu1 %vm2867_vm2, %v2865_v0 }
 0x34c   :  { %2477 = vmatpush1.bf16.msra.mxu0 %v2934_v18  ;;  %2507 = vmatpush3.bf16.msra.mxu1 %v2971_v45 }
 0x34d   :  { %2479 = vmatprep.subr.bf16.mxu0 %v2937_v19  ;;  %2508 = vmatprep.subr.bf16.mxu1 %v2866_v34 }
 0x350   :  { %2481 = vmatpush1.bf16.msra.mxu0 %v2945_v25  ;;  %2510 = vmatpush3.bf16.msra.mxu1 %v2988_v55 }
 0x351   :  { %2483 = vmatprep.subr.bf16.mxu0 %v2951_v27  ;;  %2511 = vmatprep.subr.bf16.mxu1 %v2866_v34 }
 0x354   :  { %2485 = vmatpush1.bf16.msra.mxu0 %v2964_v37  ;;  %2513 = vmatpush3.bf16.msra.mxu1 %v3008_v3 }
 0x355   :  { %2487 = vmatprep.subr.bf16.mxu0 %v2967_v39  ;;  %2514 = vmatprep.subr.bf16.mxu1 %v2866_v34 }
 0x358   :  { %2489 = vmatpush1.bf16.msra.mxu0 %v2981_v49  ;;  %2516 = vmatpush3.bf16.msra.mxu1 %v3025_v14 }
 0x359   :  { %2491 = vmatprep.subr.bf16.mxu0 %v2984_v50  ;;  %2517 = vmatprep.subr.bf16.mxu1 %v2866_v34 }
 0x35c   :  { %2493 = vmatpush1.bf16.msra.mxu0 %v2998_v59  ;;  %2519 = vmatpush3.bf16.msra.mxu1 %v3037_v20 }
 0x35d   :  { %2495 = vmatprep.subr.bf16.mxu0 %v3004_v61  ;;  %2520 = vmatprep.subr.bf16.mxu1 %v2866_v34 }
 0x360   :  { %2497 = vmatpush1.bf16.msra.mxu0 %v3015_v6  ;;  %2522 = vmatpush3.bf16.msra.mxu1 %v3045_v23 }
 0x361   :  { %2499 = vmatprep.subr.bf16.mxu0 %v3021_v10  ;;  %2523 = vmatprep.subr.bf16.mxu1 %v2866_v34 }
 0x364   :  { %2501 = vmatpush1.bf16.msra.mxu0 %v3033_v17  ;;  %2525 = vmatpush3.bf16.msra.mxu1 %v3053_v28 }
 0x365   :  { %2527 = vmatprep.subr.bf16.mxu0 %v2919_v8  ;;  %2558 = vmatprep.subr.bf16.mxu1 %v2866_v34 }
 0x41a   :  { %v976_v44 = vpop.f32.mrb[6].mxu0  ;;  %v1047_v13 = vpop.f32.mrb[14].mxu1 }
 0x41b   :  { %v2700_v15 = vadd.f32 %v976_v44, %v3108_v58  ;;  %v978_v16 = vpop.f32.mrb[7].mxu0  ;;  %v2105_v22 = vpop.f32.mrb[15].mxu1  ;;  %v1065_v32 = vadd.f32 %v3117_v21, %v1047_v13 }
 0x41c   :  { %v2701_v26 = vadd.f32 %v978_v16, %v3111_v4 }
 0x41d   :  { %v1797_v24 = vmul.f32 -1.442695, %v2700_v15 }
 0x41e   :  { %v1798_v29 = vmul.f32 -1.442695, %v2701_v26 }
 0x41f   :  { %2764 = vpow2.f32 %v1797_v24 }
 0x420   :  { %2766 = vpow2.f32 %v1798_v29 }
 0x429   :  { %v2765_v30 = vpop.eup %2764 }
 0x42a   :  { %v1059_v38 = vadd.f32 1.0, %v2765_v30  ;;  %v2767_v31 = vpop.eup %2766 }
 0x42b   :  { %v1060_v46 = vadd.f32 1.0, %v2767_v31 }
 0x42c   :  { %2768 = vrcp.f32 %v1059_v38 }
 0x436   :  { %v2769_v36 = vpop.eup %2768 }
 0x437   :  { %v1066_v41 = vmul.f32 %v2769_v36, %v1065_v32 }
 0x439   :  { %v1067_v43 = vadd.f32 %v1066_v41, %v3096_v42 }
 0x43b   :  { %2770 = vtanh.f32 %v1067_v43 }
 0x43c   :  { %2772 = vrcp.f32 %v1060_v46 }
 0x445   :  { %v2771_v48 = vpop.eup %2770 }
 0x446   :  { %v1069_v33 = vsub.f32 %v903_v11, %v2771_v48  ;;  %v2773_v40 = vpop.eup %2772 }
 0x448   :  { %v1070_v52 = vmul.f32 %v2773_v40, %v1069_v33 }
 0x44a   :  { %v1071_v54 = vadd.f32 %v2771_v48, %v1070_v52 }
 0x44c   :  { %1143 = vmatmul.mubr.f32.vlgmr.msra.gmra.mrb[8].mxu0 %v1071_v54  ;;  %2139 = vmatmul.mubr.f32.vlgmr.msra.gmra.mrb[16].mxu1 %v1071_v54 }
 0x44d   :  { %2529 = vmatpush1.bf16.msra.mxu0 %v2921_v9  ;;  %2560 = vmatpush3.bf16.msra.mxu1 %v2957_v35 }
 0x44e   :  { %2531 = vmatprep.subr.bf16.mxu0 %v2924_v12  ;;  %2561 = vmatprep.subr.bf16.mxu1 %v2866_v34 }
 0x44f   :  { %1310 = vmatprep.mubr.f32.mxu0 %v2865_v0  ;;  %2173 = vmatprep.mubr.msk.f32.mxu1 %vm2867_vm2, %v2865_v0 }
 0x451   :  { %2533 = vmatpush1.bf16.msra.mxu0 %v2934_v18  ;;  %2563 = vmatpush3.bf16.msra.mxu1 %v2971_v45 }
 0x452   :  { %2535 = vmatprep.subr.bf16.mxu0 %v2937_v19  ;;  %2564 = vmatprep.subr.bf16.mxu1 %v2866_v34 }
 0x455   :  { %2537 = vmatpush1.bf16.msra.mxu0 %v2945_v25  ;;  %2566 = vmatpush3.bf16.msra.mxu1 %v2988_v55 }
 0x456   :  { %2539 = vmatprep.subr.bf16.mxu0 %v2951_v27  ;;  %2567 = vmatprep.subr.bf16.mxu1 %v2866_v34 }
 0x459   :  { %2541 = vmatpush1.bf16.msra.mxu0 %v2964_v37  ;;  %2569 = vmatpush3.bf16.msra.mxu1 %v3008_v3 }
 0x45a   :  { %2543 = vmatprep.subr.bf16.mxu0 %v2967_v39  ;;  %2570 = vmatprep.subr.bf16.mxu1 %v2866_v34 }
 0x45d   :  { %2545 = vmatpush1.bf16.msra.mxu0 %v2981_v49  ;;  %2572 = vmatpush3.bf16.msra.mxu1 %v3025_v14 }
 0x45e   :  { %2547 = vmatprep.subr.bf16.mxu0 %v2984_v50  ;;  %2573 = vmatprep.subr.bf16.mxu1 %v2866_v34 }
 0x461   :  { %2549 = vmatpush1.bf16.msra.mxu0 %v2998_v59  ;;  %2575 = vmatpush3.bf16.msra.mxu1 %v3037_v20 }
 0x462   :  { %2551 = vmatprep.subr.bf16.mxu0 %v3004_v61  ;;  %2576 = vmatprep.subr.bf16.mxu1 %v2866_v34 }
 0x465   :  { %2553 = vmatpush1.bf16.msra.mxu0 %v3015_v6  ;;  %2578 = vmatpush3.bf16.msra.mxu1 %v3045_v23 }
 0x466   :  { %2555 = vmatprep.subr.bf16.mxu0 %v3021_v10  ;;  %2579 = vmatprep.subr.bf16.mxu1 %v2866_v34 }
 0x469   :  { %2557 = vmatpush1.bf16.msra.mxu0 %v3033_v17  ;;  %2581 = vmatpush3.bf16.msra.mxu1 %v3053_v28 }
 0x46a   :  { %2583 = vmatprep.subr.bf16.mxu0 %v2919_v8  ;;  %2614 = vmatprep.subr.bf16.mxu1 %v2866_v34 }
 0x51f   :  { %v1144_v42 = vpop.f32.mrb[8].mxu0  ;;  %v1215_v57 = vpop.f32.mrb[16].mxu1 }
 0x520   :  { %v2702_v60 = vadd.f32 %v1144_v42, %v3108_v58  ;;  %v1146_v62 = vpop.f32.mrb[9].mxu0  ;;  %v2140_v63 = vpop.f32.mrb[17].mxu1  ;;  %v1233_v13 = vadd.f32 %v3117_v21, %v1215_v57 }
 0x521   :  { %v2703_v2 = vadd.f32 %v1146_v62, %v3111_v4 }
 0x522   :  { %v1799_v1 = vmul.f32 -1.442695, %v2702_v60 }
 0x523   :  { %v1800_v5 = vmul.f32 -1.442695, %v2703_v2 }
 0x524   :  { %2774 = vpow2.f32 %v1799_v1 }
 0x525   :  { %2776 = vpow2.f32 %v1800_v5 }
 0x52e   :  { %v2775_v7 = vpop.eup %2774 }
 0x52f   :  { %v1227_v11 = vadd.f32 1.0, %v2775_v7  ;;  %v2777_v44 = vpop.eup %2776 }
 0x530   :  { %v1228_v24 = vadd.f32 1.0, %v2777_v44 }
 0x531   :  { %2778 = vrcp.f32 %v1227_v11 }
 0x53b   :  { %v2779_v15 = vpop.eup %2778 }
 0x53c   :  { %v1234_v16 = vmul.f32 %v2779_v15, %v1233_v13 }
 0x53e   :  { %v1235_v22 = vadd.f32 %v1234_v16, %v3102_v51 }
 0x540   :  { %2780 = vtanh.f32 %v1235_v22 }
 0x541   :  { %2782 = vrcp.f32 %v1228_v24 }
 0x54a   :  { %v2781_v26 = vpop.eup %2780 }
 0x54b   :  { %v1237_v29 = vsub.f32 %v1071_v54, %v2781_v26  ;;  %v2783_v30 = vpop.eup %2782 }
 0x54d   :  { %v1238_v38 = vmul.f32 %v2783_v30, %v1237_v29 }
 0x54f   :  { %v1239_v31 = vadd.f32 %v2781_v26, %v1238_v38 }
 0x551   :  { %1311 = vmatmul.mubr.f32.vlgmr.msra.gmra.mrb[10].mxu0 %v1239_v31  ;;  %2174 = vmatmul.mubr.f32.vlgmr.msra.gmra.mrb[18].mxu1 %v1239_v31 }
 0x552   :  { %2585 = vmatpush1.bf16.msra.mxu0 %v2921_v9  ;;  %2616 = vmatpush3.bf16.msra.mxu1 %v2957_v35 }
 0x553   :  { %2587 = vmatprep.subr.bf16.mxu0 %v2924_v12  ;;  %2617 = vmatprep.subr.bf16.mxu1 %v2866_v34 }
 0x554   :  { %1478 = vmatprep.mubr.f32.mxu0 %v2865_v0  ;;  %2208 = vmatprep.mubr.msk.f32.mxu1 %vm2867_vm2, %v2865_v0 }
 0x556   :  { %2589 = vmatpush1.bf16.msra.mxu0 %v2934_v18  ;;  %2619 = vmatpush3.bf16.msra.mxu1 %v2971_v45 }
 0x557   :  { %2591 = vmatprep.subr.bf16.mxu0 %v2937_v19  ;;  %2620 = vmatprep.subr.bf16.mxu1 %v2866_v34 }
 0x55a   :  { %2593 = vmatpush1.bf16.msra.mxu0 %v2945_v25  ;;  %2622 = vmatpush3.bf16.msra.mxu1 %v2988_v55 }
 0x55b   :  { %2595 = vmatprep.subr.bf16.mxu0 %v2951_v27  ;;  %2623 = vmatprep.subr.bf16.mxu1 %v2866_v34 }
 0x55e   :  { %2597 = vmatpush1.bf16.msra.mxu0 %v2964_v37  ;;  %2625 = vmatpush3.bf16.msra.mxu1 %v3008_v3 }
 0x55f   :  { %2599 = vmatprep.subr.bf16.mxu0 %v2967_v39  ;;  %2626 = vmatprep.subr.bf16.mxu1 %v2866_v34 }
 0x562   :  { %2601 = vmatpush1.bf16.msra.mxu0 %v2981_v49  ;;  %2628 = vmatpush3.bf16.msra.mxu1 %v3025_v14 }
 0x563   :  { %2603 = vmatprep.subr.bf16.mxu0 %v2984_v50  ;;  %2629 = vmatprep.subr.bf16.mxu1 %v2866_v34 }
 0x566   :  { %2605 = vmatpush1.bf16.msra.mxu0 %v2998_v59  ;;  %2631 = vmatpush3.bf16.msra.mxu1 %v3037_v20 }
 0x567   :  { %2607 = vmatprep.subr.bf16.mxu0 %v3004_v61  ;;  %2632 = vmatprep.subr.bf16.mxu1 %v2866_v34 }
 0x56a   :  { %2609 = vmatpush1.bf16.msra.mxu0 %v3015_v6  ;;  %2634 = vmatpush3.bf16.msra.mxu1 %v3045_v23 }
 0x56b   :  { %2611 = vmatprep.subr.bf16.mxu0 %v3021_v10  ;;  %2635 = vmatprep.subr.bf16.mxu1 %v2866_v34 }
 0x56e   :  { %2613 = vmatpush1.bf16.msra.mxu0 %v3033_v17  ;;  %2637 = vmatpush3.bf16.msra.mxu1 %v3053_v28 }
 0x56f   :  { %2639 = vmatprep.subr.bf16.mxu0 %v2919_v8  ;;  %2670 = vmatprep.subr.bf16.mxu1 %v2866_v34 }
 0x624   :  { %v1312_v51 = vpop.f32.mrb[10].mxu0  ;;  %v1383_v32 = vpop.f32.mrb[18].mxu1 }
 0x625   :  { %v2704_v36 = vadd.f32 %v1312_v51, %v3108_v58  ;;  %v1314_v41 = vpop.f32.mrb[11].mxu0  ;;  %v2175_v43 = vpop.f32.mrb[19].mxu1  ;;  %v1401_v8 = vadd.f32 %v3117_v21, %v1383_v32 }
 0x626   :  { %v2705_v48 = vadd.f32 %v1314_v41, %v3111_v4 }
 0x627   :  { %v1801_v46 = vmul.f32 -1.442695, %v2704_v36 }
 0x628   :  { %v1802_v33 = vmul.f32 -1.442695, %v2705_v48 }
 0x629   :  { %2784 = vpow2.f32 %v1801_v46 }
 0x62a   :  { %2786 = vpow2.f32 %v1802_v33 }
 0x633   :  { %v2785_v40 = vpop.eup %2784 }
 0x634   :  { %v1395_v52 = vadd.f32 1.0, %v2785_v40  ;;  %v2787_v54 = vpop.eup %2786 }
 0x635   :  { %v1396_v62 = vadd.f32 1.0, %v2787_v54 }
 0x636   :  { %2788 = vrcp.f32 %v1395_v52 }
 0x640   :  { %v2789_v42 = vpop.eup %2788 }
 0x641   :  { %v1402_v57 = vmul.f32 %v2789_v42, %v1401_v8 }
 0x643   :  { %v1403_v60 = vadd.f32 %v1402_v57, %v3100_v47 }
 0x645   :  { %2790 = vtanh.f32 %v1403_v60 }
 0x646   :  { %2792 = vrcp.f32 %v1396_v62 }
 0x64f   :  { %v2791_v63 = vpop.eup %2790 }
 0x650   :  { %v1405_v1 = vsub.f32 %v1239_v31, %v2791_v63  ;;  %v2793_v2 = vpop.eup %2792 }
 0x652   :  { %v1406_v5 = vmul.f32 %v2793_v2, %v1405_v1 }
 0x654   :  { %v1407_v7 = vadd.f32 %v2791_v63, %v1406_v5 }
 0x656   :  { %1479 = vmatmul.mubr.f32.vlgmr.msra.gmra.mrb[12].mxu0 %v1407_v7  ;;  %2209 = vmatmul.mubr.f32.vlgmr.msra.gmra.mrb[20].mxu1 %v1407_v7 }
 0x657   :  { %2641 = vmatpush1.bf16.msra.mxu0 %v2921_v9  ;;  %2672 = vmatpush3.bf16.msra.mxu1 %v2957_v35 }
 0x658   :  { %2643 = vmatprep.subr.bf16.mxu0 %v2924_v12  ;;  %2673 = vmatprep.subr.bf16.mxu1 %v2866_v34 }
 0x659   :  { %1646 = vmatprep.mubr.f32.mxu0 %v2865_v0  ;;  %2243 = vmatprep.mubr.msk.f32.mxu1 %vm2867_vm2, %v2865_v0 }
 0x65b   :  { %2645 = vmatpush1.bf16.msra.mxu0 %v2934_v18  ;;  %2675 = vmatpush3.bf16.msra.mxu1 %v2971_v45 }
 0x65c   :  { %2647 = vmatprep.subr.bf16.mxu0 %v2937_v19  ;;  %2676 = vmatprep.subr.bf16.mxu1 %v2866_v34 }
 0x65f   :  { %2649 = vmatpush1.bf16.msra.mxu0 %v2945_v25  ;;  %2678 = vmatpush3.bf16.msra.mxu1 %v2988_v55 }
 0x660   :  { %2651 = vmatprep.subr.bf16.mxu0 %v2951_v27  ;;  %2679 = vmatprep.subr.bf16.mxu1 %v2866_v34 }
 0x663   :  { %2653 = vmatpush1.bf16.msra.mxu0 %v2964_v37  ;;  %2681 = vmatpush3.bf16.msra.mxu1 %v3008_v3 }
 0x664   :  { %2655 = vmatprep.subr.bf16.mxu0 %v2967_v39  ;;  %2682 = vmatprep.subr.bf16.mxu1 %v2866_v34 }
 0x667   :  { %2657 = vmatpush1.bf16.msra.mxu0 %v2981_v49  ;;  %2684 = vmatpush3.bf16.msra.mxu1 %v3025_v14 }
 0x668   :  { %2659 = vmatprep.subr.bf16.mxu0 %v2984_v50  ;;  %2685 = vmatprep.subr.bf16.mxu1 %v2866_v34 }
 0x66b   :  { %2661 = vmatpush1.bf16.msra.mxu0 %v2998_v59  ;;  %2687 = vmatpush3.bf16.msra.mxu1 %v3037_v20 }
 0x66c   :  { %2663 = vmatprep.subr.bf16.mxu0 %v3004_v61  ;;  %2688 = vmatprep.subr.bf16.mxu1 %v2866_v34 }
 0x66f   :  { %2665 = vmatpush1.bf16.msra.mxu0 %v3015_v6  ;;  %2690 = vmatpush3.bf16.msra.mxu1 %v3045_v23 }
 0x670   :  { %2667 = vmatprep.subr.bf16.mxu0 %v3021_v10  ;;  %2691 = vmatprep.subr.bf16.mxu1 %v2866_v34 }
 0x673   :  { %2669 = vmatpush1.bf16.msra.mxu0 %v3033_v17  ;;  %2693 = vmatpush3.bf16.msra.mxu1 %v3053_v28 }
 0x729   :  { %v1480_v0 = vpop.f32.mrb[12].mxu0  ;;  %v1551_v9 = vpop.f32.mrb[20].mxu1 }
 0x72a   :  { %v2706_v12 = vadd.f32 %v1480_v0, %v3108_v58  ;;  %v1482_v18 = vpop.f32.mrb[13].mxu0  ;;  %v2210_v19 = vpop.f32.mrb[21].mxu1  ;;  %v1569_v45 = vadd.f32 %v3117_v21, %v1551_v9 }
 0x72b   :  { %v2707_v27 = vadd.f32 %v1482_v18, %v3111_v4 }
 0x72c   :  { %v1803_v25 = vmul.f32 -1.442695, %v2706_v12 }
 0x72d   :  { %v1804_v35 = vmul.f32 -1.442695, %v2707_v27 }
 0x72e   :  { %2794 = vpow2.f32 %v1803_v25 }
 0x72f   :  { %2796 = vpow2.f32 %v1804_v35 }
 0x738   :  { %v2795_v37 = vpop.eup %2794 }
 0x739   :  { %v1563_v39 = vadd.f32 1.0, %v2795_v37  ;;  %v2797_v34 = vpop.eup %2796 }
 0x73a   :  { %v1564_v59 = vadd.f32 1.0, %v2797_v34 }
 0x73b   :  { %2798 = vrcp.f32 %v1563_v39 }
 0x745   :  { %v2799_v49 = vpop.eup %2798 }
 0x746   :  { %v1570_v50 = vmul.f32 %v2799_v49, %v1569_v45 }
 0x748   :  { %v1571_v55 = vadd.f32 %v1570_v50, %v3106_v56 }
 0x74a   :  { %2800 = vtanh.f32 %v1571_v55 }
 0x74b   :  { %2802 = vrcp.f32 %v1564_v59 }
 0x754   :  { %v2801_v61 = vpop.eup %2800 }
 0x755   :  { %v1573_v3 = vsub.f32 %v1407_v7, %v2801_v61  ;;  %v2803_v6 = vpop.eup %2802 }
 0x757   :  { %v1574_v10 = vmul.f32 %v2803_v6, %v1573_v3 }
 0x759   :  { %v1575_v14 = vadd.f32 %v2801_v61, %v1574_v10 }
 0x75b   :  { %1647 = vmatmul.mubr.f32.vlgmr.msra.gmra.mrb[14].mxu0 %v1575_v14  ;;  %2244 = vmatmul.mubr.f32.vlgmr.msra.gmra.mrb[22].mxu1 %v1575_v14 }
 0x82e   :  { %v1648_v17 = vpop.f32.mrb[14].mxu0  ;;  %v1719_v20 = vpop.f32.mrb[22].mxu1 }
 0x82f   :  { %v2708_v23 = vadd.f32 %v1648_v17, %v3108_v58  ;;  %v1650_v28 = vpop.f32.mrb[15].mxu0  ;;  %v2245_v47 = vpop.f32.mrb[23].mxu1  ;;  %v1737_v22 = vadd.f32 %v3117_v21, %v1719_v20 }
 0x830   :  { %v2709_v56 = vadd.f32 %v1650_v28, %v3111_v4 }
 0x831   :  { %v1805_v11 = vmul.f32 -1.442695, %v2708_v23 }
 0x832   :  { %v1806_v44 = vmul.f32 -1.442695, %v2709_v56 }
 0x833   :  { %2804 = vpow2.f32 %v1805_v11 }
 0x834   :  { %2806 = vpow2.f32 %v1806_v44 }
 0x83d   :  { %v2805_v13 = vpop.eup %2804 }
 0x83e   :  { %v1731_v15 = vadd.f32 1.0, %v2805_v13  ;;  %v2807_v16 = vpop.eup %2806 }
 0x83f   :  { %v1732_v30 = vadd.f32 1.0, %v2807_v16 }
 0x840   :  { %2808 = vrcp.f32 %v1731_v15 }
 0x84a   :  { %v2809_v24 = vpop.eup %2808 }
 0x84b   :  { %v1738_v26 = vmul.f32 %v2809_v24, %v1737_v22 }
 0x84d   :  { %v1739_v29 = vadd.f32 %v1738_v26, %v3104_v53 }
 0x84f   :  { %2810 = vtanh.f32 %v1739_v29 }
 0x850   :  { %2812 = vrcp.f32 %v1732_v30 }
 0x859   :  { %v2811_v58 = vpop.eup %2810 }
 0x85a   :  { %v1741_v38 = vsub.f32 %v1575_v14, %v2811_v58  ;;  %v2813_v31 = vpop.eup %2812 }
 0x85c   :  { %v1742_v4 = vmul.f32 %v2813_v31, %v1741_v38 }
 0x85e   :  { %v1743_v51 = vadd.f32 %v2811_v58, %v1742_v4 }
 0x860   :  { %1748 = vst [vmem:[#allocation7] sm:$0xff] %v1743_v51 }
 0x861   :  { %2847 = shalt.err (!%p2844_p12)
}
 0x862   :  { %s2848_s6 = scalar_lea.hbm %s3373_s5, 128 }
 0x863   :  { %p2849_p13 = scmp.ne.s32.totalorder %s3373_s5, %s2848_s6  ;;  %p2852_p0 = scmp.lt.u32.totalorder %s2848_s6, %s3373_s5 }
 0x865   :  { %p2854_p1 = pnand %p2852_p0, %p2849_p13 }
 0x867   :  { %2857 = shalt.err (!%p2854_p1)
}
 0x868   :  { %1758 = dma.vmem_to_hbm [thread:$0]  %s1756_s27, 128, %s3373_s5, [#allocation6]  }
 0x869   :  { %2860 = dma.done.wait [#allocation6], 128  }
 0x86a   :  { %2861 = vsyncadd [#allocation6], 4294967168 }
 0x86b   :  { %1762 = vsyncpa [#allocation5], 1 }
 0x86c   :  { %1763 = vsyncpa [#allocation6], 1 }

</bundles_post_ra>
